<compile_context>
chip_gen: v7x
topology: tpu7x:2x2x1
jax: 0.10.0
libtpu: 0.0.40
codegen_flags: <defaults>
</compile_context>

<pallas_src>
import math

import jax
import jax.numpy as jnp
import numpy as np
from jax import lax
from jax.experimental import pallas as pl
from jax.experimental.pallas import tpu as pltpu

HID_SZ = 32
FF_SZ = 64
NHEADS = 4
HEAD_DIM = HID_SZ // NHEADS
NLAYERS = 2
LN_EPS = 1e-5            # nn.LayerNorm default eps
NEG_BIAS = -1e30         # finite stand-in for log(0); exp() underflows to 0


# ------------------------- in-kernel helpers -------------------------------

def _linear(x2d, w_bf16, b_f32):
    # torch nn.Linear: y = x @ W.T + b ; W: (out, in) in bf16, b: (1, out) f32.
    y = lax.dot_general(x2d.astype(jnp.bfloat16), w_bf16,
                        (((1,), (1,)), ((), ())),
                        preferred_element_type=jnp.float32)
    return y + b_f32


def _layernorm(x, g, b):
    mu = jnp.mean(x, axis=-1, keepdims=True)
    var = jnp.mean((x - mu) ** 2, axis=-1, keepdims=True)
    return (x - mu) * lax.rsqrt(var + LN_EPS) * g + b


# ------------------------------ kernel -------------------------------------

def encoder_core_kernel(x_ref, bias_ref,
                        wqkv_ref, bqkv_ref, wo_ref, bo_ref,
                        ln1g_ref, ln1b_ref,
                        w1_ref, b1_ref, w2_ref, b2_ref,
                        ln2g_ref, ln2b_ref,
                        out_ref):
    N, D = x_ref.shape                # N = B*L rows, D = hidden
    B = bias_ref.shape[0]
    L = N // B
    H, hd = NHEADS, HEAD_DIM

    x = x_ref[...]                    # (N, D) f32 running activation (VMEM-resident)
    bias = bias_ref[...]              # (B, L, L) additive mask bias, loaded ONCE

    for l in range(NLAYERS):          # static unroll: whole stack in one launch
        # ---- fused QKV projection: one (N,D)@(D,3D) MXU matmul --------------
        qkv = _linear(x, wqkv_ref[l], bqkv_ref[l])          # (N, 3D) f32
        qkv3 = qkv.reshape(B, L, 3 * D)
        q3 = qkv3[:, :, 0:D]          # already pre-scaled by 1/sqrt(hd) (glue)
        k3 = qkv3[:, :, D:2 * D]
        v3 = qkv3[:, :, 2 * D:3 * D]

        # ---- multi-head attention -------------------------------------------
        # Heads use a static H=4 loop of rank-3 (batch=B) contractions: a fully
        # head-batched rank-4 dot_general (or the 4-D (0,2,1,3) transpose needed
        # to merge B*H into one batch dim) is not reliably lowered by Mosaic, so
        # the slice/concat form is kept at this tiny size.
        # TODO(synk): switch to a single head-batched contraction once rank-4
        #             dot_general / 4-D transposes lower cleanly.
        head_outs = []
        for h in range(H):
            sl = slice(h * hd, (h + 1) * hd)
            qh = q3[:, :, sl].astype(jnp.bfloat16)
            kh = k3[:, :, sl].astype(jnp.bfloat16)
            vh = v3[:, :, sl].astype(jnp.bfloat16)
            logits = jnp.einsum('bqd,bkd->bqk', qh, kh,
                                preferred_element_type=jnp.float32)
            logits = logits + bias                           # masked keys -> -1e30
            m = jnp.max(logits, axis=-1, keepdims=True)
            e = jnp.exp(logits - m)                          # unnormalized probs
            s = jnp.sum(e, axis=-1, keepdims=True)
            # P@V first, then normalize the (B,L,hd) result: smaller elementwise
            # multiply than scaling the (B,L,L) attention matrix, same math.
            pv = jnp.einsum('bqk,bkd->bqd', e.astype(jnp.bfloat16), vh,
                            preferred_element_type=jnp.float32)
            head_outs.append(pv * pl.reciprocal(s, approx=True))   # EUP recip
        attn_out = jnp.concatenate(head_outs, axis=-1).reshape(N, D)  # merge_heads

        # ---- output projection + post-LN --------------------------------------
        y = _linear(attn_out, wo_ref[l], bo_ref[l])
        x = _layernorm(x + y, ln1g_ref[l], ln1b_ref[l])

        # ---- feedforward + post-LN ---------------------------------------------
        h1 = jnp.maximum(_linear(x, w1_ref[l], b1_ref[l]), 0.0)
        h2 = _linear(h1, w2_ref[l], b2_ref[l])
        x = _layernorm(x + h2, ln2g_ref[l], ln2b_ref[l])

    out_ref[...] = x


# ------------------------------- wrapper -------------------------------------

@jax.jit
def encoder_core(x, pad_mask, packed_params):
    """Runs the full NLAYERS EncoderCore in a single fused pallas_call."""
    B, L, D = x.shape
    bias = pad2attn_bias(pad_mask)            # computed once per call, layer-invariant
    x2 = x.reshape(B * L, D)

    # I/O is a flat (B*L, D) slab.  A fully lane-dense (B, L*D) layout (last dim
    # multiple of 128) would need an in-kernel (B*L, D) <-> (B, L*D) relayout that
    # costs as much as the handful of masked stores it saves at D=32.
    # TODO(synk): for larger B/L, add a batch grid axis with
    #             dimension_semantics=("parallel",) so v7x's two TensorCores
    #             both get work and VMEM stays bounded; at B=2, L=8 a grid only
    #             adds per-step overhead.
    args = (x2, bias) + tuple(packed_params)
    out = pl.pallas_call(
        encoder_core_kernel,
        out_shape=jax.ShapeDtypeStruct((B * L, D), jnp.float32),
        in_specs=[pl.BlockSpec(memory_space=pltpu.MemorySpace.VMEM)] * len(args),
        out_specs=pl.BlockSpec(memory_space=pltpu.MemorySpace.VMEM),
        input_output_aliases={0: 0},          # output reuses the x2 buffer
    )(*args)
    return out.reshape(B, L, D)


# ------------------------------- glue ---------------------------------------

def pad2attn_bias(pad_mask):
    # Additive equivalent of pad2attn_mask(...).log(): 0 where attention is
    # allowed (un-padded key OR diagonal), -1e30 where it is masked.
    B, L = pad_mask.shape
    allowed = jnp.logical_or(jnp.logical_not(pad_mask)[:, None, :],
                             jnp.eye(L, dtype=bool)[None])
    return jnp.where(allowed, 0.0, NEG_BIAS).astype(jnp.float32)


def pad2attn_mask(pad_mask, self_attn=True):
    # 0/1 multiplicative mask (used only by the pure-JAX reference).
    B, L = pad_mask.shape
    mask = jnp.broadcast_to(jnp.where(pad_mask[:, None, :], 0.0, 1.0),
                            (B, L, L)).astype(jnp.float32)
    if self_attn:
        mask = jnp.minimum(mask + jnp.eye(L, dtype=jnp.float32)[None], 1.0)
    return mask


def init_layer_params(key):
    ks = jax.random.split(key, 12)

    def lin(kw, kb, out_sz, in_sz):
        w = jax.random.normal(kw, (out_sz, in_sz), jnp.float32) / math.sqrt(in_sz)
        b = jax.random.normal(kb, (1, out_sz), jnp.float32) * 0.02
        return w, b

    wq, bq = lin(ks[0], ks[1], HID_SZ, HID_SZ)
    wk, bk = lin(ks[2], ks[3], HID_SZ, HID_SZ)
    wv, bv = lin(ks[4], ks[5], HID_SZ, HID_SZ)
    wo, bo = lin(ks[6], ks[7], HID_SZ, HID_SZ)
    w1, b1 = lin(ks[8], ks[9], FF_SZ, HID_SZ)
    w2, b2 = lin(ks[10], ks[11], HID_SZ, FF_SZ)
    g1 = jnp.ones((1, HID_SZ), jnp.float32)
    be1 = jnp.zeros((1, HID_SZ), jnp.float32)
    g2 = jnp.ones((1, HID_SZ), jnp.float32)
    be2 = jnp.zeros((1, HID_SZ), jnp.float32)
    return (wq, bq, wk, bk, wv, bv, wo, bo, g1, be1, w1, b1, w2, b2, g2, be2)


def pack_params(all_params):
    """Fuse QKV, fold the 1/sqrt(head_dim) scale into Q, stack over layers,
    and cast matmul weights to bf16 (biases / LN params stay f32)."""
    scale = 1.0 / math.sqrt(HEAD_DIM)
    wqkv, bqkv, wo, bo, g1, be1, w1, b1, w2, b2, g2, be2 = ([] for _ in range(12))
    for p in all_params:
        (wq, bq_, wk, bk, wv, bv, wo_, bo_,
         g1_, be1_, w1_, b1_, w2_, b2_, g2_, be2_) = p
        wqkv.append(jnp.concatenate([wq * scale, wk, wv], axis=0))     # (3D, D)
        bqkv.append(jnp.concatenate([bq_ * scale, bk, bv], axis=1))    # (1, 3D)
        wo.append(wo_); bo.append(bo_)
        g1.append(g1_); be1.append(be1_)
        w1.append(w1_); b1.append(b1_)
        w2.append(w2_); b2.append(b2_)
        g2.append(g2_); be2.append(be2_)
    st = lambda xs: jnp.stack(xs, axis=0)
    bf = lambda xs: jnp.stack(xs, axis=0).astype(jnp.bfloat16)
    return (bf(wqkv), st(bqkv), bf(wo), st(bo), st(g1), st(be1),
            bf(w1), st(b1), bf(w2), st(b2), st(g2), st(be2))


# Pure-JAX f32 reference of one EncoderLayer (mirrors the PyTorch math).
def encoder_layer_ref(x, mask, params):
    (wq, bq, wk, bk, wv, bv, wo, bo, g1, be1, w1, b1, w2, b2, g2, be2) = params
    B, L, D = x.shape
    H, d = NHEADS, HEAD_DIM

    def linear(t, w, b):
        return jnp.einsum('...i,oi->...o', t, w) + b[0]

    def ln(t, g, be):
        mu = jnp.mean(t, -1, keepdims=True)
        var = jnp.mean((t - mu) ** 2, -1, keepdims=True)
        return (t - mu) / jnp.sqrt(var + LN_EPS) * g[0] + be[0]

    def split(t):
        return t.reshape(B, L, H, d).transpose(0, 2, 1, 3)

    q, k, v = split(linear(x, wq, bq)), split(linear(x, wk, bk)), split(linear(x, wv, bv))
    logits = jnp.einsum('bhqd,bhkd->bhqk', q, k)
    logits = (logits + jnp.log(mask)[:, None]) / math.sqrt(d)
    attn = jax.nn.softmax(logits, axis=-1)
    o = jnp.einsum('bhqk,bhkd->bhqd', attn, v).transpose(0, 2, 1, 3).reshape(B, L, D)
    x = ln(x + linear(o, wo, bo), g1, be1)
    h = jax.nn.relu(linear(x, w1, b1))
    h = linear(h, w2, b2)
    return ln(x + h, g2, be2)


if __name__ == "__main__":
    key = jax.random.PRNGKey(0)
    B, L = 2, 8
    kx, kp = jax.random.split(key)
    x = jax.random.normal(kx, (B, L, HID_SZ), jnp.float32)
    pad_mask = jnp.array([[False] * 6 + [True] * 2,
                          [False] * 5 + [True] * 3])

    all_params = [init_layer_params(k) for k in jax.random.split(kp, NLAYERS)]
    packed = pack_params(all_params)

    y = jax.block_until_ready(encoder_core(x, pad_mask, packed))

    # Reference check (pure JAX, f32, same params).  Tolerance accommodates the
    # bf16 MXU operands used inside the kernel (accumulation stays f32).
    mask = pad2attn_mask(pad_mask)
    yr = x
    for p in all_params:
        yr = encoder_layer_ref(yr, mask, p)
    np.testing.assert_allclose(np.asarray(y), np.asarray(yr), rtol=5e-2, atol=5e-2)

    print("KERNEL_OK")
</pallas_src>

<mosaic_0001>
module attributes {stable_mosaic.version = 11 : i64} {
  func.func @encoder_core_kernel(%arg0: memref<16x32xf32, #tpu.memory_space<vmem>>, %arg1: memref<2x8x8xf32, #tpu.memory_space<vmem>>, %arg2: memref<2x96x32xbf16, #tpu.memory_space<vmem>>, %arg3: memref<2x1x96xf32, #tpu.memory_space<vmem>>, %arg4: memref<2x32x32xbf16, #tpu.memory_space<vmem>>, %arg5: memref<2x1x32xf32, #tpu.memory_space<vmem>>, %arg6: memref<2x1x32xf32, #tpu.memory_space<vmem>>, %arg7: memref<2x1x32xf32, #tpu.memory_space<vmem>>, %arg8: memref<2x64x32xbf16, #tpu.memory_space<vmem>>, %arg9: memref<2x1x64xf32, #tpu.memory_space<vmem>>, %arg10: memref<2x32x64xbf16, #tpu.memory_space<vmem>>, %arg11: memref<2x1x32xf32, #tpu.memory_space<vmem>>, %arg12: memref<2x1x32xf32, #tpu.memory_space<vmem>>, %arg13: memref<2x1x32xf32, #tpu.memory_space<vmem>>, %arg14: memref<16x32xf32, #tpu.memory_space<vmem>>) attributes {dimension_semantics = [], scalar_prefetch = 0 : i64, scratch_operands = 0 : i64, tpu.core_type = #tpu.core_type<tc>} {
    %c0 = arith.constant 0 : index
    %c0_0 = arith.constant 0 : index
    %0 = vector.load %arg0[%c0, %c0_0] : memref<16x32xf32, #tpu.memory_space<vmem>>, vector<16x32xf32>
    %c0_1 = arith.constant 0 : index
    %c0_2 = arith.constant 0 : index
    %c0_3 = arith.constant 0 : index
    %1 = vector.load %arg1[%c0_1, %c0_2, %c0_3] : memref<2x8x8xf32, #tpu.memory_space<vmem>>, vector<2x8x8xf32>
    %c0_4 = arith.constant 0 : index
    %c0_5 = arith.constant 0 : index
    %c0_6 = arith.constant 0 : index
    %2 = vector.load %arg2[%c0_4, %c0_5, %c0_6] : memref<2x96x32xbf16, #tpu.memory_space<vmem>>, vector<1x96x32xbf16>
    %3 = vector.shape_cast %2 : vector<1x96x32xbf16> to vector<96x32xbf16>
    %c0_7 = arith.constant 0 : index
    %c0_8 = arith.constant 0 : index
    %c0_9 = arith.constant 0 : index
    %4 = vector.load %arg3[%c0_7, %c0_8, %c0_9] : memref<2x1x96xf32, #tpu.memory_space<vmem>>, vector<1x1x96xf32>
    %5 = vector.shape_cast %4 : vector<1x1x96xf32> to vector<1x96xf32>
    %6 = arith.truncf %0 : vector<16x32xf32> to vector<16x32xbf16>
    %cst = arith.constant dense<0.000000e+00> : vector<16x96xf32>
    %7 = tpu.matmul %6, %3, %cst {dimension_numbers = #tpu.dot_dimension_numbers<[1], [1], [0], [0], [0, 0, 1, 0], [], []>} : vector<16x32xbf16>, vector<96x32xbf16>, vector<16x96xf32> -> vector<16x96xf32>
    %8 = vector.broadcast %5 : vector<1x96xf32> to vector<16x96xf32>
    %9 = arith.addf %7, %8 : vector<16x96xf32>
    %10 = vector.shape_cast %9 : vector<16x96xf32> to vector<2x8x96xf32>
    %11 = vector.extract_strided_slice %10 {offsets = [0, 0, 0], sizes = [2, 8, 32], strides = [1, 1, 1]} : vector<2x8x96xf32> to vector<2x8x32xf32>
    %12 = vector.extract_strided_slice %10 {offsets = [0, 0, 32], sizes = [2, 8, 32], strides = [1, 1, 1]} : vector<2x8x96xf32> to vector<2x8x32xf32>
    %13 = vector.extract_strided_slice %10 {offsets = [0, 0, 64], sizes = [2, 8, 32], strides = [1, 1, 1]} : vector<2x8x96xf32> to vector<2x8x32xf32>
    %14 = vector.extract_strided_slice %11 {offsets = [0, 0, 0], sizes = [2, 8, 8], strides = [1, 1, 1]} : vector<2x8x32xf32> to vector<2x8x8xf32>
    %15 = arith.truncf %14 : vector<2x8x8xf32> to vector<2x8x8xbf16>
    %16 = vector.extract_strided_slice %12 {offsets = [0, 0, 0], sizes = [2, 8, 8], strides = [1, 1, 1]} : vector<2x8x32xf32> to vector<2x8x8xf32>
    %17 = arith.truncf %16 : vector<2x8x8xf32> to vector<2x8x8xbf16>
    %18 = vector.extract_strided_slice %13 {offsets = [0, 0, 0], sizes = [2, 8, 8], strides = [1, 1, 1]} : vector<2x8x32xf32> to vector<2x8x8xf32>
    %19 = arith.truncf %18 : vector<2x8x8xf32> to vector<2x8x8xbf16>
    "tpu.trace_start"() <{level = 10 : i32, message = "bqd,bkd->bqk"}> : () -> ()
    %cst_10 = arith.constant dense<0.000000e+00> : vector<2x8x8xf32>
    %20 = tpu.matmul %15, %17, %cst_10 {dimension_numbers = #tpu.dot_dimension_numbers<[2], [2], [1], [1], [0, 0, 0, 1, 1, 1], [0], [0]>} : vector<2x8x8xbf16>, vector<2x8x8xbf16>, vector<2x8x8xf32> -> vector<2x8x8xf32>
    "tpu.trace_stop"() : () -> ()
    %21 = arith.addf %20, %1 : vector<2x8x8xf32>
    %cst_11 = arith.constant dense<0xFF800000> : vector<2x8xf32>
    %22 = vector.multi_reduction <maximumf>, %21, %cst_11 [2] : vector<2x8x8xf32> to vector<2x8xf32>
    %23 = vector.shape_cast %22 : vector<2x8xf32> to vector<2x8x1xf32>
    %24 = vector.broadcast %23 : vector<2x8x1xf32> to vector<2x8x8xf32>
    %25 = arith.subf %21, %24 : vector<2x8x8xf32>
    %26 = math.exp %25 : vector<2x8x8xf32>
    %cst_12 = arith.constant dense<0.000000e+00> : vector<2x8xf32>
    %27 = vector.multi_reduction <add>, %26, %cst_12 [2] : vector<2x8x8xf32> to vector<2x8xf32>
    %28 = vector.shape_cast %27 : vector<2x8xf32> to vector<2x8x1xf32>
    %29 = arith.truncf %26 : vector<2x8x8xf32> to vector<2x8x8xbf16>
    "tpu.trace_start"() <{level = 10 : i32, message = "bqk,bkd->bqd"}> : () -> ()
    %cst_13 = arith.constant dense<0.000000e+00> : vector<2x8x8xf32>
    %30 = tpu.matmul %29, %19, %cst_13 {dimension_numbers = #tpu.dot_dimension_numbers<[2], [1], [1], [2], [0, 0, 0, 1, 1, 2], [0], [0]>} : vector<2x8x8xbf16>, vector<2x8x8xbf16>, vector<2x8x8xf32> -> vector<2x8x8xf32>
    "tpu.trace_stop"() : () -> ()
    %31 = tpu.reciprocal %28 {approx = true} : vector<2x8x1xf32> -> vector<2x8x1xf32>
    %32 = vector.broadcast %31 : vector<2x8x1xf32> to vector<2x8x8xf32>
    %33 = arith.mulf %30, %32 : vector<2x8x8xf32>
    %34 = vector.extract_strided_slice %11 {offsets = [0, 0, 8], sizes = [2, 8, 8], strides = [1, 1, 1]} : vector<2x8x32xf32> to vector<2x8x8xf32>
    %35 = arith.truncf %34 : vector<2x8x8xf32> to vector<2x8x8xbf16>
    %36 = vector.extract_strided_slice %12 {offsets = [0, 0, 8], sizes = [2, 8, 8], strides = [1, 1, 1]} : vector<2x8x32xf32> to vector<2x8x8xf32>
    %37 = arith.truncf %36 : vector<2x8x8xf32> to vector<2x8x8xbf16>
    %38 = vector.extract_strided_slice %13 {offsets = [0, 0, 8], sizes = [2, 8, 8], strides = [1, 1, 1]} : vector<2x8x32xf32> to vector<2x8x8xf32>
    %39 = arith.truncf %38 : vector<2x8x8xf32> to vector<2x8x8xbf16>
    "tpu.trace_start"() <{level = 10 : i32, message = "bqd,bkd->bqk"}> : () -> ()
    %cst_14 = arith.constant dense<0.000000e+00> : vector<2x8x8xf32>
    %40 = tpu.matmul %35, %37, %cst_14 {dimension_numbers = #tpu.dot_dimension_numbers<[2], [2], [1], [1], [0, 0, 0, 1, 1, 1], [0], [0]>} : vector<2x8x8xbf16>, vector<2x8x8xbf16>, vector<2x8x8xf32> -> vector<2x8x8xf32>
    "tpu.trace_stop"() : () -> ()
    %41 = arith.addf %40, %1 : vector<2x8x8xf32>
    %cst_15 = arith.constant dense<0xFF800000> : vector<2x8xf32>
    %42 = vector.multi_reduction <maximumf>, %41, %cst_15 [2] : vector<2x8x8xf32> to vector<2x8xf32>
    %43 = vector.shape_cast %42 : vector<2x8xf32> to vector<2x8x1xf32>
    %44 = vector.broadcast %43 : vector<2x8x1xf32> to vector<2x8x8xf32>
    %45 = arith.subf %41, %44 : vector<2x8x8xf32>
    %46 = math.exp %45 : vector<2x8x8xf32>
    %cst_16 = arith.constant dense<0.000000e+00> : vector<2x8xf32>
    %47 = vector.multi_reduction <add>, %46, %cst_16 [2] : vector<2x8x8xf32> to vector<2x8xf32>
    %48 = vector.shape_cast %47 : vector<2x8xf32> to vector<2x8x1xf32>
    %49 = arith.truncf %46 : vector<2x8x8xf32> to vector<2x8x8xbf16>
    "tpu.trace_start"() <{level = 10 : i32, message = "bqk,bkd->bqd"}> : () -> ()
    %cst_17 = arith.constant dense<0.000000e+00> : vector<2x8x8xf32>
    %50 = tpu.matmul %49, %39, %cst_17 {dimension_numbers = #tpu.dot_dimension_numbers<[2], [1], [1], [2], [0, 0, 0, 1, 1, 2], [0], [0]>} : vector<2x8x8xbf16>, vector<2x8x8xbf16>, vector<2x8x8xf32> -> vector<2x8x8xf32>
    "tpu.trace_stop"() : () -> ()
    %51 = tpu.reciprocal %48 {approx = true} : vector<2x8x1xf32> -> vector<2x8x1xf32>
    %52 = vector.broadcast %51 : vector<2x8x1xf32> to vector<2x8x8xf32>
    %53 = arith.mulf %50, %52 : vector<2x8x8xf32>
    %54 = vector.extract_strided_slice %11 {offsets = [0, 0, 16], sizes = [2, 8, 8], strides = [1, 1, 1]} : vector<2x8x32xf32> to vector<2x8x8xf32>
    %55 = arith.truncf %54 : vector<2x8x8xf32> to vector<2x8x8xbf16>
    %56 = vector.extract_strided_slice %12 {offsets = [0, 0, 16], sizes = [2, 8, 8], strides = [1, 1, 1]} : vector<2x8x32xf32> to vector<2x8x8xf32>
    %57 = arith.truncf %56 : vector<2x8x8xf32> to vector<2x8x8xbf16>
    %58 = vector.extract_strided_slice %13 {offsets = [0, 0, 16], sizes = [2, 8, 8], strides = [1, 1, 1]} : vector<2x8x32xf32> to vector<2x8x8xf32>
    %59 = arith.truncf %58 : vector<2x8x8xf32> to vector<2x8x8xbf16>
    "tpu.trace_start"() <{level = 10 : i32, message = "bqd,bkd->bqk"}> : () -> ()
    %cst_18 = arith.constant dense<0.000000e+00> : vector<2x8x8xf32>
    %60 = tpu.matmul %55, %57, %cst_18 {dimension_numbers = #tpu.dot_dimension_numbers<[2], [2], [1], [1], [0, 0, 0, 1, 1, 1], [0], [0]>} : vector<2x8x8xbf16>, vector<2x8x8xbf16>, vector<2x8x8xf32> -> vector<2x8x8xf32>
    "tpu.trace_stop"() : () -> ()
    %61 = arith.addf %60, %1 : vector<2x8x8xf32>
    %cst_19 = arith.constant dense<0xFF800000> : vector<2x8xf32>
    %62 = vector.multi_reduction <maximumf>, %61, %cst_19 [2] : vector<2x8x8xf32> to vector<2x8xf32>
    %63 = vector.shape_cast %62 : vector<2x8xf32> to vector<2x8x1xf32>
    %64 = vector.broadcast %63 : vector<2x8x1xf32> to vector<2x8x8xf32>
    %65 = arith.subf %61, %64 : vector<2x8x8xf32>
    %66 = math.exp %65 : vector<2x8x8xf32>
    %cst_20 = arith.constant dense<0.000000e+00> : vector<2x8xf32>
    %67 = vector.multi_reduction <add>, %66, %cst_20 [2] : vector<2x8x8xf32> to vector<2x8xf32>
    %68 = vector.shape_cast %67 : vector<2x8xf32> to vector<2x8x1xf32>
    %69 = arith.truncf %66 : vector<2x8x8xf32> to vector<2x8x8xbf16>
    "tpu.trace_start"() <{level = 10 : i32, message = "bqk,bkd->bqd"}> : () -> ()
    %cst_21 = arith.constant dense<0.000000e+00> : vector<2x8x8xf32>
    %70 = tpu.matmul %69, %59, %cst_21 {dimension_numbers = #tpu.dot_dimension_numbers<[2], [1], [1], [2], [0, 0, 0, 1, 1, 2], [0], [0]>} : vector<2x8x8xbf16>, vector<2x8x8xbf16>, vector<2x8x8xf32> -> vector<2x8x8xf32>
    "tpu.trace_stop"() : () -> ()
    %71 = tpu.reciprocal %68 {approx = true} : vector<2x8x1xf32> -> vector<2x8x1xf32>
    %72 = vector.broadcast %71 : vector<2x8x1xf32> to vector<2x8x8xf32>
    %73 = arith.mulf %70, %72 : vector<2x8x8xf32>
    %74 = vector.extract_strided_slice %11 {offsets = [0, 0, 24], sizes = [2, 8, 8], strides = [1, 1, 1]} : vector<2x8x32xf32> to vector<2x8x8xf32>
    %75 = arith.truncf %74 : vector<2x8x8xf32> to vector<2x8x8xbf16>
    %76 = vector.extract_strided_slice %12 {offsets = [0, 0, 24], sizes = [2, 8, 8], strides = [1, 1, 1]} : vector<2x8x32xf32> to vector<2x8x8xf32>
    %77 = arith.truncf %76 : vector<2x8x8xf32> to vector<2x8x8xbf16>
    %78 = vector.extract_strided_slice %13 {offsets = [0, 0, 24], sizes = [2, 8, 8], strides = [1, 1, 1]} : vector<2x8x32xf32> to vector<2x8x8xf32>
    %79 = arith.truncf %78 : vector<2x8x8xf32> to vector<2x8x8xbf16>
    "tpu.trace_start"() <{level = 10 : i32, message = "bqd,bkd->bqk"}> : () -> ()
    %cst_22 = arith.constant dense<0.000000e+00> : vector<2x8x8xf32>
    %80 = tpu.matmul %75, %77, %cst_22 {dimension_numbers = #tpu.dot_dimension_numbers<[2], [2], [1], [1], [0, 0, 0, 1, 1, 1], [0], [0]>} : vector<2x8x8xbf16>, vector<2x8x8xbf16>, vector<2x8x8xf32> -> vector<2x8x8xf32>
    "tpu.trace_stop"() : () -> ()
    %81 = arith.addf %80, %1 : vector<2x8x8xf32>
    %cst_23 = arith.constant dense<0xFF800000> : vector<2x8xf32>
    %82 = vector.multi_reduction <maximumf>, %81, %cst_23 [2] : vector<2x8x8xf32> to vector<2x8xf32>
    %83 = vector.shape_cast %82 : vector<2x8xf32> to vector<2x8x1xf32>
    %84 = vector.broadcast %83 : vector<2x8x1xf32> to vector<2x8x8xf32>
    %85 = arith.subf %81, %84 : vector<2x8x8xf32>
    %86 = math.exp %85 : vector<2x8x8xf32>
    %cst_24 = arith.constant dense<0.000000e+00> : vector<2x8xf32>
    %87 = vector.multi_reduction <add>, %86, %cst_24 [2] : vector<2x8x8xf32> to vector<2x8xf32>
    %88 = vector.shape_cast %87 : vector<2x8xf32> to vector<2x8x1xf32>
    %89 = arith.truncf %86 : vector<2x8x8xf32> to vector<2x8x8xbf16>
    "tpu.trace_start"() <{level = 10 : i32, message = "bqk,bkd->bqd"}> : () -> ()
    %cst_25 = arith.constant dense<0.000000e+00> : vector<2x8x8xf32>
    %90 = tpu.matmul %89, %79, %cst_25 {dimension_numbers = #tpu.dot_dimension_numbers<[2], [1], [1], [2], [0, 0, 0, 1, 1, 2], [0], [0]>} : vector<2x8x8xbf16>, vector<2x8x8xbf16>, vector<2x8x8xf32> -> vector<2x8x8xf32>
    "tpu.trace_stop"() : () -> ()
    %91 = tpu.reciprocal %88 {approx = true} : vector<2x8x1xf32> -> vector<2x8x1xf32>
    %92 = vector.broadcast %91 : vector<2x8x1xf32> to vector<2x8x8xf32>
    %93 = arith.mulf %90, %92 : vector<2x8x8xf32>
    %94 = tpu.concatenate %33, %53, %73, %93 in 2 : vector<2x8x8xf32>, vector<2x8x8xf32>, vector<2x8x8xf32>, vector<2x8x8xf32> -> vector<2x8x32xf32>
    %95 = vector.shape_cast %94 : vector<2x8x32xf32> to vector<16x32xf32>
    %c0_26 = arith.constant 0 : index
    %c0_27 = arith.constant 0 : index
    %c0_28 = arith.constant 0 : index
    %96 = vector.load %arg4[%c0_26, %c0_27, %c0_28] : memref<2x32x32xbf16, #tpu.memory_space<vmem>>, vector<1x32x32xbf16>
    %97 = vector.shape_cast %96 : vector<1x32x32xbf16> to vector<32x32xbf16>
    %c0_29 = arith.constant 0 : index
    %c0_30 = arith.constant 0 : index
    %c0_31 = arith.constant 0 : index
    %98 = vector.load %arg5[%c0_29, %c0_30, %c0_31] : memref<2x1x32xf32, #tpu.memory_space<vmem>>, vector<1x1x32xf32>
    %99 = vector.shape_cast %98 : vector<1x1x32xf32> to vector<1x32xf32>
    %100 = arith.truncf %95 : vector<16x32xf32> to vector<16x32xbf16>
    %cst_32 = arith.constant dense<0.000000e+00> : vector<16x32xf32>
    %101 = tpu.matmul %100, %97, %cst_32 {dimension_numbers = #tpu.dot_dimension_numbers<[1], [1], [0], [0], [0, 0, 1, 0], [], []>} : vector<16x32xbf16>, vector<32x32xbf16>, vector<16x32xf32> -> vector<16x32xf32>
    %102 = vector.broadcast %99 : vector<1x32xf32> to vector<16x32xf32>
    %103 = arith.addf %101, %102 : vector<16x32xf32>
    %104 = arith.addf %0, %103 : vector<16x32xf32>
    %c0_33 = arith.constant 0 : index
    %c0_34 = arith.constant 0 : index
    %c0_35 = arith.constant 0 : index
    %105 = vector.load %arg6[%c0_33, %c0_34, %c0_35] : memref<2x1x32xf32, #tpu.memory_space<vmem>>, vector<1x1x32xf32>
    %106 = vector.shape_cast %105 : vector<1x1x32xf32> to vector<1x32xf32>
    %c0_36 = arith.constant 0 : index
    %c0_37 = arith.constant 0 : index
    %c0_38 = arith.constant 0 : index
    %107 = vector.load %arg7[%c0_36, %c0_37, %c0_38] : memref<2x1x32xf32, #tpu.memory_space<vmem>>, vector<1x1x32xf32>
    %108 = vector.shape_cast %107 : vector<1x1x32xf32> to vector<1x32xf32>
    %cst_39 = arith.constant dense<0.000000e+00> : vector<16xf32>
    %109 = vector.multi_reduction <add>, %104, %cst_39 [1] : vector<16x32xf32> to vector<16xf32>
    %110 = vector.shape_cast %109 : vector<16xf32> to vector<16x1xf32>
    %cst_40 = arith.constant 3.200000e+01 : f32
    %111 = vector.broadcast %cst_40 : f32 to vector<16x1xf32>
    %112 = arith.divf %110, %111 : vector<16x1xf32>
    %113 = vector.broadcast %112 : vector<16x1xf32> to vector<16x32xf32>
    %114 = arith.subf %104, %113 : vector<16x32xf32>
    %115 = arith.mulf %114, %114 : vector<16x32xf32>
    %cst_41 = arith.constant dense<0.000000e+00> : vector<16xf32>
    %116 = vector.multi_reduction <add>, %115, %cst_41 [1] : vector<16x32xf32> to vector<16xf32>
    %117 = vector.shape_cast %116 : vector<16xf32> to vector<16x1xf32>
    %cst_42 = arith.constant 3.200000e+01 : f32
    %118 = vector.broadcast %cst_42 : f32 to vector<16x1xf32>
    %119 = arith.divf %117, %118 : vector<16x1xf32>
    %120 = vector.broadcast %112 : vector<16x1xf32> to vector<16x32xf32>
    %121 = arith.subf %104, %120 : vector<16x32xf32>
    %cst_43 = arith.constant 9.99999974E-6 : f32
    %122 = vector.broadcast %cst_43 : f32 to vector<16x1xf32>
    %123 = arith.addf %119, %122 : vector<16x1xf32>
    %124 = math.rsqrt %123 : vector<16x1xf32>
    %125 = vector.broadcast %124 : vector<16x1xf32> to vector<16x32xf32>
    %126 = arith.mulf %121, %125 : vector<16x32xf32>
    %127 = vector.broadcast %106 : vector<1x32xf32> to vector<16x32xf32>
    %128 = arith.mulf %126, %127 : vector<16x32xf32>
    %129 = vector.broadcast %108 : vector<1x32xf32> to vector<16x32xf32>
    %130 = arith.addf %128, %129 : vector<16x32xf32>
    %c0_44 = arith.constant 0 : index
    %c0_45 = arith.constant 0 : index
    %c0_46 = arith.constant 0 : index
    %131 = vector.load %arg8[%c0_44, %c0_45, %c0_46] : memref<2x64x32xbf16, #tpu.memory_space<vmem>>, vector<1x64x32xbf16>
    %132 = vector.shape_cast %131 : vector<1x64x32xbf16> to vector<64x32xbf16>
    %c0_47 = arith.constant 0 : index
    %c0_48 = arith.constant 0 : index
    %c0_49 = arith.constant 0 : index
    %133 = vector.load %arg9[%c0_47, %c0_48, %c0_49] : memref<2x1x64xf32, #tpu.memory_space<vmem>>, vector<1x1x64xf32>
    %134 = vector.shape_cast %133 : vector<1x1x64xf32> to vector<1x64xf32>
    %135 = arith.truncf %130 : vector<16x32xf32> to vector<16x32xbf16>
    %cst_50 = arith.constant dense<0.000000e+00> : vector<16x64xf32>
    %136 = tpu.matmul %135, %132, %cst_50 {dimension_numbers = #tpu.dot_dimension_numbers<[1], [1], [0], [0], [0, 0, 1, 0], [], []>} : vector<16x32xbf16>, vector<64x32xbf16>, vector<16x64xf32> -> vector<16x64xf32>
    %137 = vector.broadcast %134 : vector<1x64xf32> to vector<16x64xf32>
    %138 = arith.addf %136, %137 : vector<16x64xf32>
    %cst_51 = arith.constant 0.000000e+00 : f32
    %139 = vector.broadcast %cst_51 : f32 to vector<16x64xf32>
    %140 = arith.maximumf %138, %139 : vector<16x64xf32>
    %c0_52 = arith.constant 0 : index
    %c0_53 = arith.constant 0 : index
    %c0_54 = arith.constant 0 : index
    %141 = vector.load %arg10[%c0_52, %c0_53, %c0_54] : memref<2x32x64xbf16, #tpu.memory_space<vmem>>, vector<1x32x64xbf16>
    %142 = vector.shape_cast %141 : vector<1x32x64xbf16> to vector<32x64xbf16>
    %c0_55 = arith.constant 0 : index
    %c0_56 = arith.constant 0 : index
    %c0_57 = arith.constant 0 : index
    %143 = vector.load %arg11[%c0_55, %c0_56, %c0_57] : memref<2x1x32xf32, #tpu.memory_space<vmem>>, vector<1x1x32xf32>
    %144 = vector.shape_cast %143 : vector<1x1x32xf32> to vector<1x32xf32>
    %145 = arith.truncf %140 : vector<16x64xf32> to vector<16x64xbf16>
    %cst_58 = arith.constant dense<0.000000e+00> : vector<16x32xf32>
    %146 = tpu.matmul %145, %142, %cst_58 {dimension_numbers = #tpu.dot_dimension_numbers<[1], [1], [0], [0], [0, 0, 1, 0], [], []>} : vector<16x64xbf16>, vector<32x64xbf16>, vector<16x32xf32> -> vector<16x32xf32>
    %147 = vector.broadcast %144 : vector<1x32xf32> to vector<16x32xf32>
    %148 = arith.addf %146, %147 : vector<16x32xf32>
    %149 = arith.addf %130, %148 : vector<16x32xf32>
    %c0_59 = arith.constant 0 : index
    %c0_60 = arith.constant 0 : index
    %c0_61 = arith.constant 0 : index
    %150 = vector.load %arg12[%c0_59, %c0_60, %c0_61] : memref<2x1x32xf32, #tpu.memory_space<vmem>>, vector<1x1x32xf32>
    %151 = vector.shape_cast %150 : vector<1x1x32xf32> to vector<1x32xf32>
    %c0_62 = arith.constant 0 : index
    %c0_63 = arith.constant 0 : index
    %c0_64 = arith.constant 0 : index
    %152 = vector.load %arg13[%c0_62, %c0_63, %c0_64] : memref<2x1x32xf32, #tpu.memory_space<vmem>>, vector<1x1x32xf32>
    %153 = vector.shape_cast %152 : vector<1x1x32xf32> to vector<1x32xf32>
    %cst_65 = arith.constant dense<0.000000e+00> : vector<16xf32>
    %154 = vector.multi_reduction <add>, %149, %cst_65 [1] : vector<16x32xf32> to vector<16xf32>
    %155 = vector.shape_cast %154 : vector<16xf32> to vector<16x1xf32>
    %cst_66 = arith.constant 3.200000e+01 : f32
    %156 = vector.broadcast %cst_66 : f32 to vector<16x1xf32>
    %157 = arith.divf %155, %156 : vector<16x1xf32>
    %158 = vector.broadcast %157 : vector<16x1xf32> to vector<16x32xf32>
    %159 = arith.subf %149, %158 : vector<16x32xf32>
    %160 = arith.mulf %159, %159 : vector<16x32xf32>
    %cst_67 = arith.constant dense<0.000000e+00> : vector<16xf32>
    %161 = vector.multi_reduction <add>, %160, %cst_67 [1] : vector<16x32xf32> to vector<16xf32>
    %162 = vector.shape_cast %161 : vector<16xf32> to vector<16x1xf32>
    %cst_68 = arith.constant 3.200000e+01 : f32
    %163 = vector.broadcast %cst_68 : f32 to vector<16x1xf32>
    %164 = arith.divf %162, %163 : vector<16x1xf32>
    %165 = vector.broadcast %157 : vector<16x1xf32> to vector<16x32xf32>
    %166 = arith.subf %149, %165 : vector<16x32xf32>
    %cst_69 = arith.constant 9.99999974E-6 : f32
    %167 = vector.broadcast %cst_69 : f32 to vector<16x1xf32>
    %168 = arith.addf %164, %167 : vector<16x1xf32>
    %169 = math.rsqrt %168 : vector<16x1xf32>
    %170 = vector.broadcast %169 : vector<16x1xf32> to vector<16x32xf32>
    %171 = arith.mulf %166, %170 : vector<16x32xf32>
    %172 = vector.broadcast %151 : vector<1x32xf32> to vector<16x32xf32>
    %173 = arith.mulf %171, %172 : vector<16x32xf32>
    %174 = vector.broadcast %153 : vector<1x32xf32> to vector<16x32xf32>
    %175 = arith.addf %173, %174 : vector<16x32xf32>
    %c1 = arith.constant 1 : index
    %c0_70 = arith.constant 0 : index
    %c0_71 = arith.constant 0 : index
    %176 = vector.load %arg2[%c1, %c0_70, %c0_71] : memref<2x96x32xbf16, #tpu.memory_space<vmem>>, vector<1x96x32xbf16>
    %177 = vector.shape_cast %176 : vector<1x96x32xbf16> to vector<96x32xbf16>
    %c1_72 = arith.constant 1 : index
    %c0_73 = arith.constant 0 : index
    %c0_74 = arith.constant 0 : index
    %178 = vector.load %arg3[%c1_72, %c0_73, %c0_74] : memref<2x1x96xf32, #tpu.memory_space<vmem>>, vector<1x1x96xf32>
    %179 = vector.shape_cast %178 : vector<1x1x96xf32> to vector<1x96xf32>
    %180 = arith.truncf %175 : vector<16x32xf32> to vector<16x32xbf16>
    %cst_75 = arith.constant dense<0.000000e+00> : vector<16x96xf32>
    %181 = tpu.matmul %180, %177, %cst_75 {dimension_numbers = #tpu.dot_dimension_numbers<[1], [1], [0], [0], [0, 0, 1, 0], [], []>} : vector<16x32xbf16>, vector<96x32xbf16>, vector<16x96xf32> -> vector<16x96xf32>
    %182 = vector.broadcast %179 : vector<1x96xf32> to vector<16x96xf32>
    %183 = arith.addf %181, %182 : vector<16x96xf32>
    %184 = vector.shape_cast %183 : vector<16x96xf32> to vector<2x8x96xf32>
    %185 = vector.extract_strided_slice %184 {offsets = [0, 0, 0], sizes = [2, 8, 32], strides = [1, 1, 1]} : vector<2x8x96xf32> to vector<2x8x32xf32>
    %186 = vector.extract_strided_slice %184 {offsets = [0, 0, 32], sizes = [2, 8, 32], strides = [1, 1, 1]} : vector<2x8x96xf32> to vector<2x8x32xf32>
    %187 = vector.extract_strided_slice %184 {offsets = [0, 0, 64], sizes = [2, 8, 32], strides = [1, 1, 1]} : vector<2x8x96xf32> to vector<2x8x32xf32>
    %188 = vector.extract_strided_slice %185 {offsets = [0, 0, 0], sizes = [2, 8, 8], strides = [1, 1, 1]} : vector<2x8x32xf32> to vector<2x8x8xf32>
    %189 = arith.truncf %188 : vector<2x8x8xf32> to vector<2x8x8xbf16>
    %190 = vector.extract_strided_slice %186 {offsets = [0, 0, 0], sizes = [2, 8, 8], strides = [1, 1, 1]} : vector<2x8x32xf32> to vector<2x8x8xf32>
    %191 = arith.truncf %190 : vector<2x8x8xf32> to vector<2x8x8xbf16>
    %192 = vector.extract_strided_slice %187 {offsets = [0, 0, 0], sizes = [2, 8, 8], strides = [1, 1, 1]} : vector<2x8x32xf32> to vector<2x8x8xf32>
    %193 = arith.truncf %192 : vector<2x8x8xf32> to vector<2x8x8xbf16>
    "tpu.trace_start"() <{level = 10 : i32, message = "bqd,bkd->bqk"}> : () -> ()
    %cst_76 = arith.constant dense<0.000000e+00> : vector<2x8x8xf32>
    %194 = tpu.matmul %189, %191, %cst_76 {dimension_numbers = #tpu.dot_dimension_numbers<[2], [2], [1], [1], [0, 0, 0, 1, 1, 1], [0], [0]>} : vector<2x8x8xbf16>, vector<2x8x8xbf16>, vector<2x8x8xf32> -> vector<2x8x8xf32>
    "tpu.trace_stop"() : () -> ()
    %195 = arith.addf %194, %1 : vector<2x8x8xf32>
    %cst_77 = arith.constant dense<0xFF800000> : vector<2x8xf32>
    %196 = vector.multi_reduction <maximumf>, %195, %cst_77 [2] : vector<2x8x8xf32> to vector<2x8xf32>
    %197 = vector.shape_cast %196 : vector<2x8xf32> to vector<2x8x1xf32>
    %198 = vector.broadcast %197 : vector<2x8x1xf32> to vector<2x8x8xf32>
    %199 = arith.subf %195, %198 : vector<2x8x8xf32>
    %200 = math.exp %199 : vector<2x8x8xf32>
    %cst_78 = arith.constant dense<0.000000e+00> : vector<2x8xf32>
    %201 = vector.multi_reduction <add>, %200, %cst_78 [2] : vector<2x8x8xf32> to vector<2x8xf32>
    %202 = vector.shape_cast %201 : vector<2x8xf32> to vector<2x8x1xf32>
    %203 = arith.truncf %200 : vector<2x8x8xf32> to vector<2x8x8xbf16>
    "tpu.trace_start"() <{level = 10 : i32, message = "bqk,bkd->bqd"}> : () -> ()
    %cst_79 = arith.constant dense<0.000000e+00> : vector<2x8x8xf32>
    %204 = tpu.matmul %203, %193, %cst_79 {dimension_numbers = #tpu.dot_dimension_numbers<[2], [1], [1], [2], [0, 0, 0, 1, 1, 2], [0], [0]>} : vector<2x8x8xbf16>, vector<2x8x8xbf16>, vector<2x8x8xf32> -> vector<2x8x8xf32>
    "tpu.trace_stop"() : () -> ()
    %205 = tpu.reciprocal %202 {approx = true} : vector<2x8x1xf32> -> vector<2x8x1xf32>
    %206 = vector.broadcast %205 : vector<2x8x1xf32> to vector<2x8x8xf32>
    %207 = arith.mulf %204, %206 : vector<2x8x8xf32>
    %208 = vector.extract_strided_slice %185 {offsets = [0, 0, 8], sizes = [2, 8, 8], strides = [1, 1, 1]} : vector<2x8x32xf32> to vector<2x8x8xf32>
    %209 = arith.truncf %208 : vector<2x8x8xf32> to vector<2x8x8xbf16>
    %210 = vector.extract_strided_slice %186 {offsets = [0, 0, 8], sizes = [2, 8, 8], strides = [1, 1, 1]} : vector<2x8x32xf32> to vector<2x8x8xf32>
    %211 = arith.truncf %210 : vector<2x8x8xf32> to vector<2x8x8xbf16>
    %212 = vector.extract_strided_slice %187 {offsets = [0, 0, 8], sizes = [2, 8, 8], strides = [1, 1, 1]} : vector<2x8x32xf32> to vector<2x8x8xf32>
    %213 = arith.truncf %212 : vector<2x8x8xf32> to vector<2x8x8xbf16>
    "tpu.trace_start"() <{level = 10 : i32, message = "bqd,bkd->bqk"}> : () -> ()
    %cst_80 = arith.constant dense<0.000000e+00> : vector<2x8x8xf32>
    %214 = tpu.matmul %209, %211, %cst_80 {dimension_numbers = #tpu.dot_dimension_numbers<[2], [2], [1], [1], [0, 0, 0, 1, 1, 1], [0], [0]>} : vector<2x8x8xbf16>, vector<2x8x8xbf16>, vector<2x8x8xf32> -> vector<2x8x8xf32>
    "tpu.trace_stop"() : () -> ()
    %215 = arith.addf %214, %1 : vector<2x8x8xf32>
    %cst_81 = arith.constant dense<0xFF800000> : vector<2x8xf32>
    %216 = vector.multi_reduction <maximumf>, %215, %cst_81 [2] : vector<2x8x8xf32> to vector<2x8xf32>
    %217 = vector.shape_cast %216 : vector<2x8xf32> to vector<2x8x1xf32>
    %218 = vector.broadcast %217 : vector<2x8x1xf32> to vector<2x8x8xf32>
    %219 = arith.subf %215, %218 : vector<2x8x8xf32>
    %220 = math.exp %219 : vector<2x8x8xf32>
    %cst_82 = arith.constant dense<0.000000e+00> : vector<2x8xf32>
    %221 = vector.multi_reduction <add>, %220, %cst_82 [2] : vector<2x8x8xf32> to vector<2x8xf32>
    %222 = vector.shape_cast %221 : vector<2x8xf32> to vector<2x8x1xf32>
    %223 = arith.truncf %220 : vector<2x8x8xf32> to vector<2x8x8xbf16>
    "tpu.trace_start"() <{level = 10 : i32, message = "bqk,bkd->bqd"}> : () -> ()
    %cst_83 = arith.constant dense<0.000000e+00> : vector<2x8x8xf32>
    %224 = tpu.matmul %223, %213, %cst_83 {dimension_numbers = #tpu.dot_dimension_numbers<[2], [1], [1], [2], [0, 0, 0, 1, 1, 2], [0], [0]>} : vector<2x8x8xbf16>, vector<2x8x8xbf16>, vector<2x8x8xf32> -> vector<2x8x8xf32>
    "tpu.trace_stop"() : () -> ()
    %225 = tpu.reciprocal %222 {approx = true} : vector<2x8x1xf32> -> vector<2x8x1xf32>
    %226 = vector.broadcast %225 : vector<2x8x1xf32> to vector<2x8x8xf32>
    %227 = arith.mulf %224, %226 : vector<2x8x8xf32>
    %228 = vector.extract_strided_slice %185 {offsets = [0, 0, 16], sizes = [2, 8, 8], strides = [1, 1, 1]} : vector<2x8x32xf32> to vector<2x8x8xf32>
    %229 = arith.truncf %228 : vector<2x8x8xf32> to vector<2x8x8xbf16>
    %230 = vector.extract_strided_slice %186 {offsets = [0, 0, 16], sizes = [2, 8, 8], strides = [1, 1, 1]} : vector<2x8x32xf32> to vector<2x8x8xf32>
    %231 = arith.truncf %230 : vector<2x8x8xf32> to vector<2x8x8xbf16>
    %232 = vector.extract_strided_slice %187 {offsets = [0, 0, 16], sizes = [2, 8, 8], strides = [1, 1, 1]} : vector<2x8x32xf32> to vector<2x8x8xf32>
    %233 = arith.truncf %232 : vector<2x8x8xf32> to vector<2x8x8xbf16>
    "tpu.trace_start"() <{level = 10 : i32, message = "bqd,bkd->bqk"}> : () -> ()
    %cst_84 = arith.constant dense<0.000000e+00> : vector<2x8x8xf32>
    %234 = tpu.matmul %229, %231, %cst_84 {dimension_numbers = #tpu.dot_dimension_numbers<[2], [2], [1], [1], [0, 0, 0, 1, 1, 1], [0], [0]>} : vector<2x8x8xbf16>, vector<2x8x8xbf16>, vector<2x8x8xf32> -> vector<2x8x8xf32>
    "tpu.trace_stop"() : () -> ()
    %235 = arith.addf %234, %1 : vector<2x8x8xf32>
    %cst_85 = arith.constant dense<0xFF800000> : vector<2x8xf32>
    %236 = vector.multi_reduction <maximumf>, %235, %cst_85 [2] : vector<2x8x8xf32> to vector<2x8xf32>
    %237 = vector.shape_cast %236 : vector<2x8xf32> to vector<2x8x1xf32>
    %238 = vector.broadcast %237 : vector<2x8x1xf32> to vector<2x8x8xf32>
    %239 = arith.subf %235, %238 : vector<2x8x8xf32>
    %240 = math.exp %239 : vector<2x8x8xf32>
    %cst_86 = arith.constant dense<0.000000e+00> : vector<2x8xf32>
    %241 = vector.multi_reduction <add>, %240, %cst_86 [2] : vector<2x8x8xf32> to vector<2x8xf32>
    %242 = vector.shape_cast %241 : vector<2x8xf32> to vector<2x8x1xf32>
    %243 = arith.truncf %240 : vector<2x8x8xf32> to vector<2x8x8xbf16>
    "tpu.trace_start"() <{level = 10 : i32, message = "bqk,bkd->bqd"}> : () -> ()
    %cst_87 = arith.constant dense<0.000000e+00> : vector<2x8x8xf32>
    %244 = tpu.matmul %243, %233, %cst_87 {dimension_numbers = #tpu.dot_dimension_numbers<[2], [1], [1], [2], [0, 0, 0, 1, 1, 2], [0], [0]>} : vector<2x8x8xbf16>, vector<2x8x8xbf16>, vector<2x8x8xf32> -> vector<2x8x8xf32>
    "tpu.trace_stop"() : () -> ()
    %245 = tpu.reciprocal %242 {approx = true} : vector<2x8x1xf32> -> vector<2x8x1xf32>
    %246 = vector.broadcast %245 : vector<2x8x1xf32> to vector<2x8x8xf32>
    %247 = arith.mulf %244, %246 : vector<2x8x8xf32>
    %248 = vector.extract_strided_slice %185 {offsets = [0, 0, 24], sizes = [2, 8, 8], strides = [1, 1, 1]} : vector<2x8x32xf32> to vector<2x8x8xf32>
    %249 = arith.truncf %248 : vector<2x8x8xf32> to vector<2x8x8xbf16>
    %250 = vector.extract_strided_slice %186 {offsets = [0, 0, 24], sizes = [2, 8, 8], strides = [1, 1, 1]} : vector<2x8x32xf32> to vector<2x8x8xf32>
    %251 = arith.truncf %250 : vector<2x8x8xf32> to vector<2x8x8xbf16>
    %252 = vector.extract_strided_slice %187 {offsets = [0, 0, 24], sizes = [2, 8, 8], strides = [1, 1, 1]} : vector<2x8x32xf32> to vector<2x8x8xf32>
    %253 = arith.truncf %252 : vector<2x8x8xf32> to vector<2x8x8xbf16>
    "tpu.trace_start"() <{level = 10 : i32, message = "bqd,bkd->bqk"}> : () -> ()
    %cst_88 = arith.constant dense<0.000000e+00> : vector<2x8x8xf32>
    %254 = tpu.matmul %249, %251, %cst_88 {dimension_numbers = #tpu.dot_dimension_numbers<[2], [2], [1], [1], [0, 0, 0, 1, 1, 1], [0], [0]>} : vector<2x8x8xbf16>, vector<2x8x8xbf16>, vector<2x8x8xf32> -> vector<2x8x8xf32>
    "tpu.trace_stop"() : () -> ()
    %255 = arith.addf %254, %1 : vector<2x8x8xf32>
    %cst_89 = arith.constant dense<0xFF800000> : vector<2x8xf32>
    %256 = vector.multi_reduction <maximumf>, %255, %cst_89 [2] : vector<2x8x8xf32> to vector<2x8xf32>
    %257 = vector.shape_cast %256 : vector<2x8xf32> to vector<2x8x1xf32>
    %258 = vector.broadcast %257 : vector<2x8x1xf32> to vector<2x8x8xf32>
    %259 = arith.subf %255, %258 : vector<2x8x8xf32>
    %260 = math.exp %259 : vector<2x8x8xf32>
    %cst_90 = arith.constant dense<0.000000e+00> : vector<2x8xf32>
    %261 = vector.multi_reduction <add>, %260, %cst_90 [2] : vector<2x8x8xf32> to vector<2x8xf32>
    %262 = vector.shape_cast %261 : vector<2x8xf32> to vector<2x8x1xf32>
    %263 = arith.truncf %260 : vector<2x8x8xf32> to vector<2x8x8xbf16>
    "tpu.trace_start"() <{level = 10 : i32, message = "bqk,bkd->bqd"}> : () -> ()
    %cst_91 = arith.constant dense<0.000000e+00> : vector<2x8x8xf32>
    %264 = tpu.matmul %263, %253, %cst_91 {dimension_numbers = #tpu.dot_dimension_numbers<[2], [1], [1], [2], [0, 0, 0, 1, 1, 2], [0], [0]>} : vector<2x8x8xbf16>, vector<2x8x8xbf16>, vector<2x8x8xf32> -> vector<2x8x8xf32>
    "tpu.trace_stop"() : () -> ()
    %265 = tpu.reciprocal %262 {approx = true} : vector<2x8x1xf32> -> vector<2x8x1xf32>
    %266 = vector.broadcast %265 : vector<2x8x1xf32> to vector<2x8x8xf32>
    %267 = arith.mulf %264, %266 : vector<2x8x8xf32>
    %268 = tpu.concatenate %207, %227, %247, %267 in 2 : vector<2x8x8xf32>, vector<2x8x8xf32>, vector<2x8x8xf32>, vector<2x8x8xf32> -> vector<2x8x32xf32>
    %269 = vector.shape_cast %268 : vector<2x8x32xf32> to vector<16x32xf32>
    %c1_92 = arith.constant 1 : index
    %c0_93 = arith.constant 0 : index
    %c0_94 = arith.constant 0 : index
    %270 = vector.load %arg4[%c1_92, %c0_93, %c0_94] : memref<2x32x32xbf16, #tpu.memory_space<vmem>>, vector<1x32x32xbf16>
    %271 = vector.shape_cast %270 : vector<1x32x32xbf16> to vector<32x32xbf16>
    %c1_95 = arith.constant 1 : index
    %c0_96 = arith.constant 0 : index
    %c0_97 = arith.constant 0 : index
    %272 = vector.load %arg5[%c1_95, %c0_96, %c0_97] : memref<2x1x32xf32, #tpu.memory_space<vmem>>, vector<1x1x32xf32>
    %273 = vector.shape_cast %272 : vector<1x1x32xf32> to vector<1x32xf32>
    %274 = arith.truncf %269 : vector<16x32xf32> to vector<16x32xbf16>
    %cst_98 = arith.constant dense<0.000000e+00> : vector<16x32xf32>
    %275 = tpu.matmul %274, %271, %cst_98 {dimension_numbers = #tpu.dot_dimension_numbers<[1], [1], [0], [0], [0, 0, 1, 0], [], []>} : vector<16x32xbf16>, vector<32x32xbf16>, vector<16x32xf32> -> vector<16x32xf32>
    %276 = vector.broadcast %273 : vector<1x32xf32> to vector<16x32xf32>
    %277 = arith.addf %275, %276 : vector<16x32xf32>
    %278 = arith.addf %175, %277 : vector<16x32xf32>
    %c1_99 = arith.constant 1 : index
    %c0_100 = arith.constant 0 : index
    %c0_101 = arith.constant 0 : index
    %279 = vector.load %arg6[%c1_99, %c0_100, %c0_101] : memref<2x1x32xf32, #tpu.memory_space<vmem>>, vector<1x1x32xf32>
    %280 = vector.shape_cast %279 : vector<1x1x32xf32> to vector<1x32xf32>
    %c1_102 = arith.constant 1 : index
    %c0_103 = arith.constant 0 : index
    %c0_104 = arith.constant 0 : index
    %281 = vector.load %arg7[%c1_102, %c0_103, %c0_104] : memref<2x1x32xf32, #tpu.memory_space<vmem>>, vector<1x1x32xf32>
    %282 = vector.shape_cast %281 : vector<1x1x32xf32> to vector<1x32xf32>
    %cst_105 = arith.constant dense<0.000000e+00> : vector<16xf32>
    %283 = vector.multi_reduction <add>, %278, %cst_105 [1] : vector<16x32xf32> to vector<16xf32>
    %284 = vector.shape_cast %283 : vector<16xf32> to vector<16x1xf32>
    %cst_106 = arith.constant 3.200000e+01 : f32
    %285 = vector.broadcast %cst_106 : f32 to vector<16x1xf32>
    %286 = arith.divf %284, %285 : vector<16x1xf32>
    %287 = vector.broadcast %286 : vector<16x1xf32> to vector<16x32xf32>
    %288 = arith.subf %278, %287 : vector<16x32xf32>
    %289 = arith.mulf %288, %288 : vector<16x32xf32>
    %cst_107 = arith.constant dense<0.000000e+00> : vector<16xf32>
    %290 = vector.multi_reduction <add>, %289, %cst_107 [1] : vector<16x32xf32> to vector<16xf32>
    %291 = vector.shape_cast %290 : vector<16xf32> to vector<16x1xf32>
    %cst_108 = arith.constant 3.200000e+01 : f32
    %292 = vector.broadcast %cst_108 : f32 to vector<16x1xf32>
    %293 = arith.divf %291, %292 : vector<16x1xf32>
    %294 = vector.broadcast %286 : vector<16x1xf32> to vector<16x32xf32>
    %295 = arith.subf %278, %294 : vector<16x32xf32>
    %cst_109 = arith.constant 9.99999974E-6 : f32
    %296 = vector.broadcast %cst_109 : f32 to vector<16x1xf32>
    %297 = arith.addf %293, %296 : vector<16x1xf32>
    %298 = math.rsqrt %297 : vector<16x1xf32>
    %299 = vector.broadcast %298 : vector<16x1xf32> to vector<16x32xf32>
    %300 = arith.mulf %295, %299 : vector<16x32xf32>
    %301 = vector.broadcast %280 : vector<1x32xf32> to vector<16x32xf32>
    %302 = arith.mulf %300, %301 : vector<16x32xf32>
    %303 = vector.broadcast %282 : vector<1x32xf32> to vector<16x32xf32>
    %304 = arith.addf %302, %303 : vector<16x32xf32>
    %c1_110 = arith.constant 1 : index
    %c0_111 = arith.constant 0 : index
    %c0_112 = arith.constant 0 : index
    %305 = vector.load %arg8[%c1_110, %c0_111, %c0_112] : memref<2x64x32xbf16, #tpu.memory_space<vmem>>, vector<1x64x32xbf16>
    %306 = vector.shape_cast %305 : vector<1x64x32xbf16> to vector<64x32xbf16>
    %c1_113 = arith.constant 1 : index
    %c0_114 = arith.constant 0 : index
    %c0_115 = arith.constant 0 : index
    %307 = vector.load %arg9[%c1_113, %c0_114, %c0_115] : memref<2x1x64xf32, #tpu.memory_space<vmem>>, vector<1x1x64xf32>
    %308 = vector.shape_cast %307 : vector<1x1x64xf32> to vector<1x64xf32>
    %309 = arith.truncf %304 : vector<16x32xf32> to vector<16x32xbf16>
    %cst_116 = arith.constant dense<0.000000e+00> : vector<16x64xf32>
    %310 = tpu.matmul %309, %306, %cst_116 {dimension_numbers = #tpu.dot_dimension_numbers<[1], [1], [0], [0], [0, 0, 1, 0], [], []>} : vector<16x32xbf16>, vector<64x32xbf16>, vector<16x64xf32> -> vector<16x64xf32>
    %311 = vector.broadcast %308 : vector<1x64xf32> to vector<16x64xf32>
    %312 = arith.addf %310, %311 : vector<16x64xf32>
    %cst_117 = arith.constant 0.000000e+00 : f32
    %313 = vector.broadcast %cst_117 : f32 to vector<16x64xf32>
    %314 = arith.maximumf %312, %313 : vector<16x64xf32>
    %c1_118 = arith.constant 1 : index
    %c0_119 = arith.constant 0 : index
    %c0_120 = arith.constant 0 : index
    %315 = vector.load %arg10[%c1_118, %c0_119, %c0_120] : memref<2x32x64xbf16, #tpu.memory_space<vmem>>, vector<1x32x64xbf16>
    %316 = vector.shape_cast %315 : vector<1x32x64xbf16> to vector<32x64xbf16>
    %c1_121 = arith.constant 1 : index
    %c0_122 = arith.constant 0 : index
    %c0_123 = arith.constant 0 : index
    %317 = vector.load %arg11[%c1_121, %c0_122, %c0_123] : memref<2x1x32xf32, #tpu.memory_space<vmem>>, vector<1x1x32xf32>
    %318 = vector.shape_cast %317 : vector<1x1x32xf32> to vector<1x32xf32>
    %319 = arith.truncf %314 : vector<16x64xf32> to vector<16x64xbf16>
    %cst_124 = arith.constant dense<0.000000e+00> : vector<16x32xf32>
    %320 = tpu.matmul %319, %316, %cst_124 {dimension_numbers = #tpu.dot_dimension_numbers<[1], [1], [0], [0], [0, 0, 1, 0], [], []>} : vector<16x64xbf16>, vector<32x64xbf16>, vector<16x32xf32> -> vector<16x32xf32>
    %321 = vector.broadcast %318 : vector<1x32xf32> to vector<16x32xf32>
    %322 = arith.addf %320, %321 : vector<16x32xf32>
    %323 = arith.addf %304, %322 : vector<16x32xf32>
    %c1_125 = arith.constant 1 : index
    %c0_126 = arith.constant 0 : index
    %c0_127 = arith.constant 0 : index
    %324 = vector.load %arg12[%c1_125, %c0_126, %c0_127] : memref<2x1x32xf32, #tpu.memory_space<vmem>>, vector<1x1x32xf32>
    %325 = vector.shape_cast %324 : vector<1x1x32xf32> to vector<1x32xf32>
    %c1_128 = arith.constant 1 : index
    %c0_129 = arith.constant 0 : index
    %c0_130 = arith.constant 0 : index
    %326 = vector.load %arg13[%c1_128, %c0_129, %c0_130] : memref<2x1x32xf32, #tpu.memory_space<vmem>>, vector<1x1x32xf32>
    %327 = vector.shape_cast %326 : vector<1x1x32xf32> to vector<1x32xf32>
    %cst_131 = arith.constant dense<0.000000e+00> : vector<16xf32>
    %328 = vector.multi_reduction <add>, %323, %cst_131 [1] : vector<16x32xf32> to vector<16xf32>
    %329 = vector.shape_cast %328 : vector<16xf32> to vector<16x1xf32>
    %cst_132 = arith.constant 3.200000e+01 : f32
    %330 = vector.broadcast %cst_132 : f32 to vector<16x1xf32>
    %331 = arith.divf %329, %330 : vector<16x1xf32>
    %332 = vector.broadcast %331 : vector<16x1xf32> to vector<16x32xf32>
    %333 = arith.subf %323, %332 : vector<16x32xf32>
    %334 = arith.mulf %333, %333 : vector<16x32xf32>
    %cst_133 = arith.constant dense<0.000000e+00> : vector<16xf32>
    %335 = vector.multi_reduction <add>, %334, %cst_133 [1] : vector<16x32xf32> to vector<16xf32>
    %336 = vector.shape_cast %335 : vector<16xf32> to vector<16x1xf32>
    %cst_134 = arith.constant 3.200000e+01 : f32
    %337 = vector.broadcast %cst_134 : f32 to vector<16x1xf32>
    %338 = arith.divf %336, %337 : vector<16x1xf32>
    %339 = vector.broadcast %331 : vector<16x1xf32> to vector<16x32xf32>
    %340 = arith.subf %323, %339 : vector<16x32xf32>
    %cst_135 = arith.constant 9.99999974E-6 : f32
    %341 = vector.broadcast %cst_135 : f32 to vector<16x1xf32>
    %342 = arith.addf %338, %341 : vector<16x1xf32>
    %343 = math.rsqrt %342 : vector<16x1xf32>
    %344 = vector.broadcast %343 : vector<16x1xf32> to vector<16x32xf32>
    %345 = arith.mulf %340, %344 : vector<16x32xf32>
    %346 = vector.broadcast %325 : vector<1x32xf32> to vector<16x32xf32>
    %347 = arith.mulf %345, %346 : vector<16x32xf32>
    %348 = vector.broadcast %327 : vector<1x32xf32> to vector<16x32xf32>
    %349 = arith.addf %347, %348 : vector<16x32xf32>
    %c0_136 = arith.constant 0 : index
    %c0_137 = arith.constant 0 : index
    %350 = vector.load %arg14[%c0_136, %c0_137] : memref<16x32xf32, #tpu.memory_space<vmem>>, vector<16x32xf32>
    tpu.vector_store %arg14[%c0_136, %c0_137], %349 {strides = array<i32>} : memref<16x32xf32, #tpu.memory_space<vmem>>, vector<16x32xf32>,
    return
  }
}

</mosaic_0001>

<bundles_post_ra>
// kernel: encoder_core.1
= control target key start
LH: loop header
LB: loop body
LE: loop exit
PB: predicated region body
PF: predicated region fallthrough
CT: control target
= control target key end

     0   :  { %vm102_vm0 = vcmask 261120   ;;  %v3437_v0 = vmov 0.0   ;;  %vm3438_vm1 = vmmov 0   ;;  %s3440_s15 = smov 64   ;;  %s3441_s16 = smov 88   ;;  %vm170_vm2 = vcmask 64512   ;;  %s4208_s2 = inlined_call_operand.vmem [shape: bf16[2,96,32], index: 2, kind: input, shape index: {}]   ;;  %s4209_s0 = inlined_call_operand.vmem [shape: f32[16,32], index: 0, kind: input, shape index: {}, may-alias: {0,14}]   ;;  %s4210_s3 = inlined_call_operand.vmem [shape: f32[2,1,96], index: 3, kind: input, shape index: {}]   ;;  %s4211_s1 = inlined_call_operand.vmem [shape: f32[2,8,8], index: 1, kind: input, shape index: {}]   ;;  %s4212_s4 = inlined_call_operand.vmem [shape: bf16[2,32,32], index: 4, kind: input, shape index: {}]   ;;  %s4213_s5 = inlined_call_operand.vmem [shape: f32[2,1,32], index: 5, kind: input, shape index: {}]   ;;  %s4214_s8 = inlined_call_operand.vmem [shape: bf16[2,64,32], index: 8, kind: input, shape index: {}]   ;;  %s4215_s10 = inlined_call_operand.vmem [shape: bf16[2,32,64], index: 10, kind: input, shape index: {}]   ;;  %s4216_s6 = inlined_call_operand.vmem [shape: f32[2,1,32], index: 6, kind: input, shape index: {}]   ;;  %s4217_s7 = inlined_call_operand.vmem [shape: f32[2,1,32], index: 7, kind: input, shape index: {}]   ;;  %s4218_s9 = inlined_call_operand.vmem [shape: f32[2,1,64], index: 9, kind: input, shape index: {}]   ;;  %s4219_s11 = inlined_call_operand.vmem [shape: f32[2,1,32], index: 11, kind: input, shape index: {}]   ;;  %s4220_s12 = inlined_call_operand.vmem [shape: f32[2,1,32], index: 12, kind: input, shape index: {}]   ;;  %s4221_s13 = inlined_call_operand.vmem [shape: f32[2,1,32], index: 13, kind: input, shape index: {}]   ;;  %s4222_s14 = inlined_call_operand.vmem [shape: f32[16,32], index: 14, kind: output, shape index: {}, may-alias: {0,14}]  }
   0x1   :  { %3001 = vmatprep.subr.bf16.mxu0 %v3437_v0  ;;  %v3327_v1 = vld [vmem:[%s4208_s2] sm:$0xff]   ;;  %3013 = vmatprep.mubr.msk.bf16.mxu0 %vm3438_vm1, %v3437_v0  ;;  %v3328_v3 = vld [vmem:[%s4208_s2 + $0x8] sm:$0xff]   ;;  %v3329_v5 = vld [vmem:[%s4208_s2 + $0x10] sm:$0xff]   ;;  %s3442_s17 = smov 120   ;;  %s3443_s18 = smov 56   ;;  %vm291_vm3 = vcmask 1043456  }
   0x2   :  { %3017 = vmatprep.subr.bf16.mxu1 %v3437_v0  ;;  %3019 = vmatprep.mubr.msk.bf16.mxu1 %vm3438_vm1, %v3437_v0  ;;  %v107_v2 = vsel %vm102_vm0, %v3327_v1, 0  ;;  %v110_v4 = vsel %vm102_vm0, %v3328_v3, 0  ;;  %v113_v6 = vsel %vm102_vm0, %v3329_v5, 0  ;;  %v3330_v7 = vld [vmem:[%s4208_s2 + $0x18] sm:$0xff]   ;;  %v3331_v9 = vld [vmem:[%s4208_s2 + $0x20] sm:$0xff]   ;;  %v3332_v11 = vld [vmem:[%s4208_s2 + $0x28] sm:$0xff]  }
   0x3   :  { %3002 = vmatpush3.bf16.xpose.msra.mxu0 %v107_v2  ;;  %v116_v8 = vsel %vm102_vm0, %v3330_v7, 0  ;;  %v119_v10 = vsel %vm102_vm0, %v3331_v9, 0  ;;  %v122_v12 = vsel %vm102_vm0, %v3332_v11, 0  ;;  %v3566_v13 = vld [vmem:[%s4209_s0] sm:$0xff]  ;;  %v3571_v14 = vld [vmem:[%s4209_s0 + $0x8] sm:$0xff]  ;;  %s3439_s0 = smov 96  }
   0x4   :  { %3003 = vmatprep.subr.bf16.mxu0 %v3437_v0  ;;  %v65_v15 = vpack.c.bf16 %v3571_v14, %v3566_v13  ;;  %v2781_v16 = vld [vmem:[%s4210_s3] ss:$0 sm:$0xff]  ;;  %v3628_v44 = vld [vmem:[%s4211_s1 + $0x8] sm:$0xff]  ;;  %s3444_s23 = smov 80   ;;  %s3445_s24 = smov 112   ;;  %vm1073_vm4 = vcmask 130048  }
   0x5   :  { %v3621_v37 = vld [vmem:[%s4211_s1] sm:$0xff]  ;;  %s3446_s25 = smov 48   ;;  %s3447_s26 = smov 72   ;;  %vm1076_vm5 = vcmask 195584   ;;  %vm1314_vm6 = vcmask 523264  }
   0x6   :  { %s3448_s27 = smov 104   ;;  %s3449_s28 = smov 40  }
   0x7   :  { %s4225_s29 = smov 8   ;;  %s4224_s30 = smov 16  }
   0x8   :  { %s4223_s19 = smov 24  }
   0xb   :  { %3004 = vmatpush3.bf16.xpose.msra.mxu0 %v110_v4 }
   0xc   :  { %3005 = vmatprep.subr.bf16.mxu0 %v3437_v0 }
  0x13   :  { %3006 = vmatpush3.bf16.xpose.msra.mxu0 %v113_v6 }
  0x14   :  { %3007 = vmatprep.subr.bf16.mxu0 %v3437_v0 }
  0x1b   :  { %3008 = vmatpush3.bf16.xpose.msra.mxu0 %v116_v8 }
  0x1c   :  { %3009 = vmatprep.subr.bf16.mxu0 %v3437_v0 }
  0x23   :  { %3010 = vmatpush3.bf16.xpose.msra.mxu0 %v119_v10 }
  0x24   :  { %3011 = vmatprep.subr.bf16.mxu0 %v3437_v0 }
  0x2b   :  { %3012 = vmatpush3.bf16.xpose.msra.mxu0 %v122_v12 }
  0x2c   :  { %3053 = vmatprep.subr.bf16.mxu0 %v3437_v0 }
  0x32   :  { %3014 = vmatmul.mubr.msk.bf16.vlgmr.msra.gmra.mrb[0].mxu0 %vm102_vm0, %v65_v15 }
  0x33   :  { %3055 = vmatprep.mubr.msk.bf16.mxu0 %vm3438_vm1, %v3437_v0 }
 0x105   :  { %v158_v17 = vpop.f32.mrb[0].mxu0 }
 0x106   :  { %v159_v18 = vadd.f32 %v2781_v16, %v158_v17  ;;  %v3015_v19 = vpop.f32.mrb[1].mxu0 }
 0x107   :  { %v161_v20 = vpop.f32.mrb[2].mxu0 }
 0x108   :  { %v3582_v21 = vpack.c.bf16 %v159_v18, %v159_v18  ;;  %v162_v22 = vadd.f32 %v2781_v16, %v161_v20  ;;  %v3016_v23 = vpop.f32.mrb[3].mxu0 }
 0x10a   :  { %168 = vrot.lane.b32.xlu0 %v3582_v21, %s3439_s0  ;;  %v3586_v24 = vpack.c.bf16 %v162_v22, %v162_v22 }
 0x10e   :  { %218 = vrot.lane.b32.xlu0 %v3586_v24, %s3439_s0 }
 0x112   :  { %286 = vrot.lane.b32.xlu0 %v3582_v21, %s3440_s15 }
 0x116   :  { %389 = vrot.lane.b32.xlu0 %v3582_v21, %s3441_s16 }
 0x11a   :  { %387 = vrot.lane.b32.xlu0 %v3582_v21, %s3442_s17 }
 0x11e   :  { %439 = vrot.lane.b32.xlu0 %v3586_v24, %s3441_s16 }
 0x122   :  { %437 = vrot.lane.b32.xlu0 %v3586_v24, %s3442_s17 }
 0x126   :  { %507 = vrot.lane.b32.xlu0 %v3582_v21, %s3443_s18 }
 0x17c   :  { %v169_v25 = vpop.permute.xlu0 %168 }
 0x17d   :  { %v175_v26 = vsel %vm170_vm2, %v169_v25, 0 }
 0x17e   :  { %3018 = vmatpush3.bf16.xpose.msra.mxu1 %v175_v26 }
 0x17f   :  { %3023 = vmatprep.subr.bf16.mxu1 %v3437_v0 }
 0x180   :  { %v219_v27 = vpop.permute.xlu0 %218 }
 0x181   :  { %v224_v29 = vsel %vm170_vm2, %v219_v27, 0 }
 0x184   :  { %v287_v28 = vpop.permute.xlu0 %286 }
 0x185   :  { %3020 = vmatmul.mubr.msk.bf16.vlgmr.msra.gmra.mrb[0].mxu1 %vm170_vm2, %v3582_v21  ;;  %v293_v32 = vsel %vm291_vm3, %v287_v28, 0 }
 0x186   :  { %3024 = vmatpush3.bf16.xpose.msra.mxu1 %v224_v29  ;;  %3025 = vmatprep.mubr.msk.bf16.mxu1 %vm3438_vm1, %v3437_v0 }
 0x187   :  { %3029 = vmatprep.subr.bf16.mxu1 %v3437_v0 }
 0x188   :  { %v390_v30 = vpop.permute.xlu0 %389 }
 0x189   :  { %v395_v63 = vsel %vm170_vm2, %v390_v30, 0 }
 0x18c   :  { %v388_v31 = vpop.permute.xlu0 %387 }
 0x18d   :  { %3026 = vmatmul.mubr.msk.bf16.vlgmr.msra.gmra.mrb[4].mxu1 %vm170_vm2, %v3586_v24 }
 0x18e   :  { %3030 = vmatpush3.bf16.msra.mxu1 %v293_v32  ;;  %3031 = vmatprep.mubr.msk.bf16.mxu1 %vm3438_vm1, %v3437_v0 }
 0x18f   :  { %3035 = vmatprep.subr.bf16.mxu1 %v3437_v0 }
 0x190   :  { %v440_v33 = vpop.permute.xlu0 %439 }
 0x191   :  { %v445_v1 = vsel %vm170_vm2, %v440_v33, 0 }
 0x194   :  { %v438_v34 = vpop.permute.xlu0 %437 }
 0x198   :  { %v508_v35 = vpop.permute.xlu0 %507 }
 0x199   :  { %v513_v36 = vsel %vm291_vm3, %v508_v35, 0 }
 0x19a   :  { %3054 = vmatpush3.bf16.msra.mxu0 %v513_v36 }
 0x19b   :  { %3065 = vmatprep.subr.bf16.mxu0 %v3437_v0 }
 0x258   :  { %v211_v38 = vpop.f32.mrb[0].mxu1 }
 0x259   :  { %v212_v39 = vadd.f32 %v211_v38, %v3621_v37  ;;  %v3021_v40 = vpop.f32.mrb[1].mxu1 }
 0x25a   :  { %v214_v41 = vpop.f32.mrb[2].mxu1 }
 0x25b   :  { %v3022_v42 = vpop.f32.mrb[3].mxu1  ;;  %v266_v43 = vsel %vm170_vm2, %v212_v39, -inf }
 0x25c   :  { %267 = vmax.xlane.f32.xlu1 %v266_v43 }
 0x260   :  { %v260_v45 = vpop.f32.mrb[4].mxu1 }
 0x261   :  { %v261_v46 = vadd.f32 %v260_v45, %v3628_v44  ;;  %v3027_v47 = vpop.f32.mrb[5].mxu1 }
 0x262   :  { %v263_v48 = vpop.f32.mrb[6].mxu1 }
 0x263   :  { %v3028_v49 = vpop.f32.mrb[7].mxu1  ;;  %v269_v50 = vsel %vm170_vm2, %v261_v46, -inf }
 0x264   :  { %270 = vmax.xlane.f32.xlu1 %v269_v50 }
 0x275   :  { %335 = vrot.lane.b32.xlu1 %v3586_v24, %s3440_s15 }
 0x279   :  { %555 = vrot.lane.b32.xlu1 %v3586_v24, %s3443_s18 }
 0x2e9   :  { %v268_v51 = vpop.xlane.xlu1 %267 }
 0x2ea   :  { %v272_v52 = vsub.f32 %v212_v39, %v268_v51 }
 0x2ec   :  { %v274_v53 = vmul.f32 1.442695, %v272_v52 }
 0x2ee   :  { %3355 = vpow2.f32 %v274_v53 }
 0x2f1   :  { %v271_v54 = vpop.xlane.xlu1 %270 }
 0x2f2   :  { %v273_v55 = vsub.f32 %v261_v46, %v271_v54 }
 0x2f4   :  { %v276_v56 = vmul.f32 1.442695, %v273_v55 }
 0x2f5   :  { %v336_v58 = vpop.permute.xlu1 %335 }
 0x2f6   :  { %3357 = vpow2.f32 %v276_v56  ;;  %v341_v60 = vsel %vm291_vm3, %v336_v58, 0 }
 0x2f8   :  { %v3636_v57 = vpop.eup %3355 }
 0x2f9   :  { %v284_v59 = vpack.c.bf16 %v3636_v57, %v3636_v57  ;;  %v556_v2 = vpop.permute.xlu1 %555 }
 0x2fa   :  { %v561_v3 = vsel %vm291_vm3, %v556_v2, 0 }
 0x2fb   :  { %3032 = vmatmul.mubr.msk.bf16.vlgmr.msra.gmra.mrb[8].mxu1 %vm170_vm2, %v284_v59 }
 0x2fc   :  { %3036 = vmatpush3.bf16.msra.mxu1 %v341_v60  ;;  %3037 = vmatprep.mubr.msk.bf16.mxu1 %vm3438_vm1, %v3437_v0 }
 0x2fd   :  { %3041 = vmatprep.subr.bf16.mxu1 %v3437_v0 }
 0x300   :  { %v3645_v61 = vpop.eup %3357 }
 0x301   :  { %v285_v62 = vpack.c.bf16 %v3645_v61, %v3645_v61 }
 0x303   :  { %3038 = vmatmul.mubr.msk.bf16.vlgmr.msra.gmra.mrb[12].mxu1 %vm170_vm2, %v285_v62 }
 0x304   :  { %3043 = vmatprep.mubr.msk.bf16.mxu1 %vm3438_vm1, %v3437_v0 }
 0x305   :  { %3042 = vmatpush3.bf16.xpose.msra.mxu1 %v395_v63 }
 0x306   :  { %3047 = vmatprep.subr.bf16.mxu1 %v3437_v0 }
 0x30c   :  { %3044 = vmatmul.mubr.msk.bf16.vlgmr.msra.gmra.mrb[16].mxu1 %vm170_vm2, %v388_v31 }
 0x30d   :  { %3048 = vmatpush3.bf16.xpose.msra.mxu1 %v445_v1  ;;  %3049 = vmatprep.mubr.msk.bf16.mxu1 %vm3438_vm1, %v3437_v0 }
 0x30e   :  { %3059 = vmatprep.subr.bf16.mxu1 %v3437_v0 }
 0x314   :  { %3050 = vmatmul.mubr.msk.bf16.vlgmr.msra.gmra.mrb[20].mxu1 %vm170_vm2, %v438_v34 }
 0x315   :  { %3060 = vmatpush3.bf16.msra.mxu1 %v561_v3  ;;  %3061 = vmatprep.mubr.msk.bf16.mxu1 %vm3438_vm1, %v3437_v0 }
 0x316   :  { %3071 = vmatprep.subr.bf16.mxu1 %v3437_v0 }
 0x3ce   :  { %v3664_v4 = vpop.f32.mrb[8].mxu1 }
 0x3cf   :  { %v3033_v5 = vpop.f32.mrb[9].mxu1 }
 0x3d0   :  { %v332_v6 = vpop.f32.mrb[10].mxu1 }
 0x3d1   :  { %v3034_v7 = vpop.f32.mrb[11].mxu1 }
 0x3d6   :  { %v3666_v8 = vpop.f32.mrb[12].mxu1 }
 0x3d7   :  { %v3039_v9 = vpop.f32.mrb[13].mxu1 }
 0x3d8   :  { %v380_v10 = vpop.f32.mrb[14].mxu1 }
 0x3d9   :  { %v3040_v11 = vpop.f32.mrb[15].mxu1 }
 0x3df   :  { %v431_v12 = vpop.f32.mrb[16].mxu1 }
 0x3e0   :  { %v432_v15 = vadd.f32 %v431_v12, %v3621_v37  ;;  %v3045_v16 = vpop.f32.mrb[17].mxu1 }
 0x3e1   :  { %v434_v17 = vpop.f32.mrb[18].mxu1 }
 0x3e2   :  { %v3046_v18 = vpop.f32.mrb[19].mxu1  ;;  %v487_v19 = vsel %vm170_vm2, %v432_v15, -inf }
 0x3e3   :  { %488 = vmax.xlane.f32.xlu1 %v487_v19 }
 0x3e7   :  { %v481_v20 = vpop.f32.mrb[20].mxu1 }
 0x3e8   :  { %v482_v22 = vadd.f32 %v481_v20, %v3628_v44  ;;  %v3051_v23 = vpop.f32.mrb[21].mxu1 }
 0x3e9   :  { %v484_v25 = vpop.f32.mrb[22].mxu1 }
 0x3ea   :  { %v3052_v26 = vpop.f32.mrb[23].mxu1  ;;  %v490_v27 = vsel %vm170_vm2, %v482_v22, -inf }
 0x3eb   :  { %491 = vmax.xlane.f32.xlu0 %v490_v27 }
 0x3f4   :  { %609 = vrot.lane.b32.xlu1 %v3582_v21, %s3444_s23 }
 0x3f8   :  { %607 = vrot.lane.b32.xlu1 %v3582_v21, %s3445_s24 }
 0x3fc   :  { %775 = vrot.lane.b32.xlu1 %v3586_v24, %s3446_s25 }
 0x401   :  { %659 = vrot.lane.b32.xlu0 %v3586_v24, %s3444_s23 }
 0x405   :  { %657 = vrot.lane.b32.xlu0 %v3586_v24, %s3445_s24 }
 0x409   :  { %727 = vrot.lane.b32.xlu0 %v3582_v21, %s3446_s25 }
 0x470   :  { %v489_v28 = vpop.xlane.xlu1 %488 }
 0x471   :  { %v493_v29 = vsub.f32 %v432_v15, %v489_v28 }
 0x473   :  { %v495_v30 = vmul.f32 1.442695, %v493_v29 }
 0x474   :  { %v610_v36 = vpop.permute.xlu1 %609 }
 0x475   :  { %3359 = vpow2.f32 %v495_v30  ;;  %v615_v40 = vsel %vm170_vm2, %v610_v36, 0 }
 0x478   :  { %v492_v31 = vpop.xlane.xlu0 %491  ;;  %v608_v45 = vpop.permute.xlu1 %607 }
 0x479   :  { %v494_v32 = vsub.f32 %v482_v22, %v492_v31 }
 0x47b   :  { %v497_v33 = vmul.f32 1.442695, %v494_v32 }
 0x47c   :  { %v660_v34 = vpop.permute.xlu0 %659  ;;  %v776_v48 = vpop.permute.xlu1 %775 }
 0x47d   :  { %3361 = vpow2.f32 %v497_v33  ;;  %v665_v46 = vsel %vm170_vm2, %v660_v34, 0  ;;  %v781_v49 = vsel %vm291_vm3, %v776_v48, 0 }
 0x47f   :  { %v3684_v35 = vpop.eup %3359 }
 0x480   :  { %v505_v38 = vpack.c.bf16 %v3684_v35, %v3684_v35  ;;  %v658_v39 = vpop.permute.xlu0 %657 }
 0x482   :  { %3056 = vmatmul.mubr.msk.bf16.vlgmr.msra.gmra.mrb[4].mxu0 %vm170_vm2, %v505_v38 }
 0x483   :  { %3066 = vmatpush3.bf16.xpose.msra.mxu0 %v615_v40  ;;  %3067 = vmatprep.mubr.msk.bf16.mxu0 %vm3438_vm1, %v3437_v0 }
 0x484   :  { %3077 = vmatprep.subr.bf16.mxu0 %v3437_v0  ;;  %v728_v42 = vpop.permute.xlu0 %727 }
 0x485   :  { %v733_v47 = vsel %vm291_vm3, %v728_v42, 0 }
 0x487   :  { %v3693_v41 = vpop.eup %3361 }
 0x488   :  { %v506_v43 = vpack.c.bf16 %v3693_v41, %v3693_v41 }
 0x48a   :  { %3062 = vmatmul.mubr.msk.bf16.vlgmr.msra.gmra.mrb[24].mxu1 %vm170_vm2, %v506_v43  ;;  %3068 = vmatmul.mubr.msk.bf16.vlgmr.msra.gmra.mrb[8].mxu0 %vm170_vm2, %v608_v45 }
 0x48b   :  { %3072 = vmatpush3.bf16.xpose.msra.mxu1 %v665_v46  ;;  %3078 = vmatpush3.bf16.msra.mxu0 %v733_v47 }
 0x48c   :  { %3073 = vmatprep.mubr.msk.bf16.mxu1 %vm3438_vm1, %v3437_v0  ;;  %3083 = vmatprep.subr.bf16.mxu1 %v3437_v0 }
 0x48d   :  { %3079 = vmatprep.mubr.msk.bf16.mxu0 %vm3438_vm1, %v3437_v0  ;;  %3089 = vmatprep.subr.bf16.mxu0 %v3437_v0 }
 0x492   :  { %3074 = vmatmul.mubr.msk.bf16.vlgmr.msra.gmra.mrb[28].mxu1 %vm170_vm2, %v658_v39 }
 0x493   :  { %3084 = vmatpush3.bf16.msra.mxu1 %v781_v49  ;;  %3085 = vmatprep.mubr.msk.bf16.mxu1 %vm3438_vm1, %v3437_v0 }
 0x494   :  { %3095 = vmatprep.subr.bf16.mxu1 %v3437_v0 }
 0x555   :  { %v3712_v50 = vpop.f32.mrb[4].mxu0 }
 0x556   :  { %v3057_v51 = vpop.f32.mrb[5].mxu0 }
 0x557   :  { %v552_v52 = vpop.f32.mrb[6].mxu0 }
 0x558   :  { %v3058_v53 = vpop.f32.mrb[7].mxu0 }
 0x55d   :  { %v3714_v54 = vpop.f32.mrb[24].mxu1  ;;  %v651_v55 = vpop.f32.mrb[8].mxu0 }
 0x55e   :  { %v652_v56 = vadd.f32 %v651_v55, %v3621_v37  ;;  %v3063_v58 = vpop.f32.mrb[25].mxu1  ;;  %v3069_v59 = vpop.f32.mrb[9].mxu0 }
 0x55f   :  { %v600_v60 = vpop.f32.mrb[26].mxu1  ;;  %v654_v62 = vpop.f32.mrb[10].mxu0 }
 0x560   :  { %v3064_v63 = vpop.f32.mrb[27].mxu1  ;;  %v3070_v1 = vpop.f32.mrb[11].mxu0  ;;  %v707_v2 = vsel %vm170_vm2, %v652_v56, -inf }
 0x561   :  { %708 = vmax.xlane.f32.xlu1 %v707_v2 }
 0x565   :  { %v701_v3 = vpop.f32.mrb[28].mxu1 }
 0x566   :  { %v702_v5 = vadd.f32 %v701_v3, %v3628_v44  ;;  %v3075_v6 = vpop.f32.mrb[29].mxu1 }
 0x567   :  { %v704_v7 = vpop.f32.mrb[30].mxu1 }
 0x568   :  { %v3076_v9 = vpop.f32.mrb[31].mxu1  ;;  %v710_v10 = vsel %vm170_vm2, %v702_v5, -inf }
 0x569   :  { %711 = vmax.xlane.f32.xlu0 %v710_v10  ;;  %v278_v9 = vsel %vm170_vm2, %v3636_v57, 0.0 }
 0x572   :  { %829 = vrot.lane.b32.xlu1 %v3582_v21, %s3447_s26 }
 0x576   :  { %827 = vrot.lane.b32.xlu1 %v3582_v21, %s3448_s27 }
 0x57f   :  { %879 = vrot.lane.b32.xlu0 %v3586_v24, %s3447_s26 }
 0x583   :  { %877 = vrot.lane.b32.xlu0 %v3586_v24, %s3448_s27 }
 0x5ee   :  { %v709_v11 = vpop.xlane.xlu1 %708 }
 0x5ef   :  { %v713_v12 = vsub.f32 %v652_v56, %v709_v11 }
 0x5f1   :  { %v715_v15 = vmul.f32 1.442695, %v713_v12 }
 0x5f2   :  { %v830_v20 = vpop.permute.xlu1 %829 }
 0x5f3   :  { %3363 = vpow2.f32 %v715_v15  ;;  %v835_v23 = vsel %vm170_vm2, %v830_v20, 0  ;;  %v281_v15 = vsel %vm170_vm2, %v3645_v61, 0.0 }
 0x5f6   :  { %v712_v16 = vpop.xlane.xlu0 %711  ;;  %v828_v28 = vpop.permute.xlu1 %827 }
 0x5f7   :  { %v714_v17 = vsub.f32 %v702_v5, %v712_v16 }
 0x5f9   :  { %v717_v18 = vmul.f32 1.442695, %v714_v17 }
 0x5fa   :  { %v880_v26 = vpop.permute.xlu0 %879 }
 0x5fb   :  { %3365 = vpow2.f32 %v717_v18  ;;  %v885_v29 = vsel %vm170_vm2, %v880_v26, 0 }
 0x5fd   :  { %v3364_v19 = vpop.eup %3363 }
 0x5fe   :  { %v725_v22 = vpack.c.bf16 %v3364_v19, %v3364_v19  ;;  %v878_v30 = vpop.permute.xlu0 %877  ;;  %v719_v59 = vsel %vm170_vm2, %v3364_v19, 0.0 }
 0x600   :  { %3080 = vmatmul.mubr.msk.bf16.vlgmr.msra.gmra.mrb[12].mxu0 %vm170_vm2, %v725_v22 }
 0x601   :  { %3090 = vmatpush3.bf16.xpose.msra.mxu0 %v835_v23  ;;  %3091 = vmatprep.mubr.msk.bf16.mxu0 %vm3438_vm1, %v3437_v0 }
 0x602   :  { %3101 = vmatprep.subr.bf16.mxu0 %v3437_v0 }
 0x605   :  { %v3366_v25 = vpop.eup %3365 }
 0x606   :  { %v726_v27 = vpack.c.bf16 %v3366_v25, %v3366_v25  ;;  %v722_v58 = vsel %vm170_vm2, %v3366_v25, 0.0 }
 0x608   :  { %3086 = vmatmul.mubr.msk.bf16.vlgmr.msra.gmra.mrb[32].mxu1 %vm170_vm2, %v726_v27  ;;  %3092 = vmatmul.mubr.msk.bf16.vlgmr.msra.gmra.mrb[16].mxu0 %vm170_vm2, %v828_v28 }
 0x609   :  { %3096 = vmatpush3.bf16.xpose.msra.mxu1 %v885_v29  ;;  %3097 = vmatprep.mubr.msk.bf16.mxu1 %vm3438_vm1, %v3437_v0 }
 0x60a   :  { %3107 = vmatprep.subr.bf16.mxu1 %v3437_v0  ;;  %3103 = vmatprep.mubr.msk.bf16.mxu0 %vm3438_vm1, %v3437_v0 }
 0x610   :  { %3098 = vmatmul.mubr.msk.bf16.vlgmr.msra.gmra.mrb[36].mxu1 %vm170_vm2, %v878_v30  ;;  %v3334_v30 = vld [vmem:[%s4212_s4 + $0x8] sm:$0xff]  }
 0x611   :  { %3109 = vmatprep.mubr.msk.bf16.mxu1 %vm3438_vm1, %v3437_v0 }
 0x6d3   :  { %v3744_v31 = vpop.f32.mrb[12].mxu0 }
 0x6d4   :  { %v3081_v32 = vpop.f32.mrb[13].mxu0 }
 0x6d5   :  { %v772_v33 = vpop.f32.mrb[14].mxu0 }
 0x6d6   :  { %v3082_v34 = vpop.f32.mrb[15].mxu0 }
 0x6db   :  { %v3746_v36 = vpop.f32.mrb[32].mxu1  ;;  %v871_v38 = vpop.f32.mrb[16].mxu0 }
 0x6dc   :  { %v872_v39 = vadd.f32 %v871_v38, %v3621_v37  ;;  %v3087_v40 = vpop.f32.mrb[33].mxu1  ;;  %v3093_v42 = vpop.f32.mrb[17].mxu0  ;;  %v499_v37 = vsel %vm170_vm2, %v3684_v35, 0.0 }
 0x6dd   :  { %v820_v43 = vpop.f32.mrb[34].mxu1  ;;  %v874_v45 = vpop.f32.mrb[18].mxu0 }
 0x6de   :  { %v3088_v46 = vpop.f32.mrb[35].mxu1  ;;  %v3094_v47 = vpop.f32.mrb[19].mxu0  ;;  %v927_v48 = vsel %vm170_vm2, %v872_v39, -inf }
 0x6df   :  { %928 = vmax.xlane.f32.xlu1 %v927_v48 }
 0x6e3   :  { %v921_v49 = vpop.f32.mrb[36].mxu1 }
 0x6e4   :  { %v922_v51 = vadd.f32 %v921_v49, %v3628_v44  ;;  %v3099_v52 = vpop.f32.mrb[37].mxu1  ;;  %v502_v44 = vsel %vm170_vm2, %v3693_v41, 0.0 }
 0x6e5   :  { %v924_v53 = vpop.f32.mrb[38].mxu1 }
 0x6e6   :  { %v3100_v55 = vpop.f32.mrb[39].mxu1  ;;  %v930_v56 = vsel %vm170_vm2, %v922_v51, -inf }
 0x6e7   :  { %931 = vmax.xlane.f32.xlu0 %v930_v56 }
 0x6f0   :  { %995 = vrot.lane.b32.xlu1 %v3586_v24, %s3449_s28 }
 0x6fd   :  { %947 = vrot.lane.b32.xlu0 %v3582_v21, %s3449_s28 }
 0x714   :  { %500 = vadd.xlane.f32.xlu1 %v499_v37 }
 0x718   :  { %723 = vadd.xlane.f32.xlu1 %v722_v58 }
 0x71c   :  { %503 = vadd.xlane.f32.xlu0 %v502_v44 }
 0x720   :  { %720 = vadd.xlane.f32.xlu0 %v719_v59 }
 0x76c   :  { %v929_v60 = vpop.xlane.xlu1 %928 }
 0x76d   :  { %v933_v62 = vsub.f32 %v872_v39, %v929_v60 }
 0x76f   :  { %v935_v24 = vmul.f32 1.442695, %v933_v62 }
 0x770   :  { %v996_v63 = vpop.permute.xlu1 %995 }
 0x771   :  { %3367 = vpow2.f32 %v935_v24  ;;  %v1001_v21 = vsel %vm291_vm3, %v996_v63, 0 }
 0x772   :  { %3108 = vmatpush3.bf16.msra.mxu1 %v1001_v21 }
 0x773   :  { %3121 = vmatprep.subr.bf16.mxu1 %v3437_v0 }
 0x774   :  { %v932_v35 = vpop.xlane.xlu0 %931 }
 0x775   :  { %v934_v1 = vsub.f32 %v922_v51, %v932_v35 }
 0x777   :  { %v937_v2 = vmul.f32 1.442695, %v934_v1 }
 0x778   :  { %v948_v3 = vpop.permute.xlu0 %947 }
 0x779   :  { %3369 = vpow2.f32 %v937_v2  ;;  %v953_v41 = vsel %vm291_vm3, %v948_v3, 0 }
 0x77a   :  { %3102 = vmatpush3.bf16.msra.mxu0 %v953_v41 }
 0x77b   :  { %v3368_v5 = vpop.eup %3367  ;;  %3113 = vmatprep.subr.bf16.mxu0 %v3437_v0 }
 0x77c   :  { %v939_v6 = vsel %vm170_vm2, %v3368_v5, 0.0  ;;  %v945_v7 = vpack.c.bf16 %v3368_v5, %v3368_v5 }
 0x77d   :  { %940 = vadd.xlane.f32.xlu0 %v939_v6 }
 0x77e   :  { %3104 = vmatmul.mubr.msk.bf16.vlgmr.msra.gmra.mrb[20].mxu0 %vm170_vm2, %v945_v7 }
 0x77f   :  { %3117 = vmatprep.mubr.msk.bf16.mxu0 %vm3438_vm1, %v3437_v0 }
 0x781   :  { %279 = vadd.xlane.f32.xlu0 %v278_v9 }
 0x783   :  { %v3370_v10 = vpop.eup %3369 }
 0x784   :  { %v942_v11 = vsel %vm170_vm2, %v3370_v10, 0.0  ;;  %v946_v12 = vpack.c.bf16 %v3370_v10, %v3370_v10 }
 0x785   :  { %943 = vadd.xlane.f32.xlu1 %v942_v11 }
 0x786   :  { %3110 = vmatmul.mubr.msk.bf16.vlgmr.msra.gmra.mrb[40].mxu1 %vm170_vm2, %v946_v12 }
 0x787   :  { %3129 = vmatprep.mubr.msk.bf16.mxu1 %vm3438_vm1, %v3437_v0 }
 0x789   :  { %282 = vadd.xlane.f32.xlu1 %v281_v15 }
 0x7a1   :  { %v501_v16 = vpop.xlane.xlu1 %500 }
 0x7a2   :  { %3371 = vrcp.f32 %v501_v16 }
 0x7a5   :  { %v724_v17 = vpop.xlane.xlu1 %723 }
 0x7a9   :  { %v504_v18 = vpop.xlane.xlu0 %503 }
 0x7aa   :  { %3373 = vrcp.f32 %v504_v18 }
 0x7ab   :  { %3375 = vrcp.f32 %v724_v17 }
 0x7ac   :  { %v3372_v19 = vpop.eup %3371 }
 0x7ad   :  { %v721_v57 = vpop.xlane.xlu0 %720  ;;  %v605_v22 = vmul.f32 %v3372_v19, %v3712_v50  ;;  %v3333_v50 = vld [vmem:[%s4212_s4] sm:$0xff]  }
 0x7ae   :  { %3377 = vrcp.f32 %v721_v57 }
 0x7b4   :  { %v3374_v20 = vpop.eup %3373 }
 0x7b5   :  { %v606_v23 = vmul.f32 %v3374_v20, %v3714_v54  ;;  %v3376_v25 = vpop.eup %3375  ;;  %v1105_v54 = vsel %vm102_vm0, %v3333_v50, 0  ;;  %v3335_v20 = vld [vmem:[%s4214_s8] sm:$0xff]  }
 0x7b6   :  { %v826_v28 = vmul.f32 %v3376_v25, %v3746_v36  ;;  %3114 = vmatpush3.bf16.xpose.msra.mxu0 %v1105_v54  ;;  %v3336_v54 = vld [vmem:[%s4214_s8 + $0x8] sm:$0xff]  }
 0x7b7   :  { %v3297_v26 = vpack.i.bf16 %v606_v23, %v605_v22  ;;  %3115 = vmatprep.subr.bf16.mxu0 %v3437_v0  ;;  %v1238_v22 = vsel %vm102_vm0, %v3335_v20, 0 }
 0x7b8   :  { %v3378_v27 = vpop.eup %3377  ;;  %3122 = vmatpush3.bf16.xpose.msra.mxu1 %v1238_v22  ;;  %v3343_v22 = vld [vmem:[%s4208_s2 + $0x40] sm:$0xff]  }
 0x7b9   :  { %3298 = vrot.lane.b32.xlu0 %v3297_v26, %s4225_s29  ;;  %v825_v61 = vmul.f32 %v3378_v27, %v3744_v31  ;;  %v1108_v31 = vsel %vm102_vm0, %v3334_v30, 0  ;;  %3123 = vmatprep.subr.bf16.mxu1 %v3437_v0  ;;  %v1241_v30 = vsel %vm102_vm0, %v3336_v54, 0 }
 0x7bb   :  { %v3302_v29 = vpack.i.bf16 %v826_v28, %v825_v61 }
 0x7bd   :  { %3303 = vrot.lane.b32.xlu1 %v3302_v29, %s4224_s30 }
 0x7be   :  { %3116 = vmatpush3.bf16.xpose.msra.mxu0 %v1108_v31  ;;  %v3337_v31 = vld [vmem:[%s4214_s8 + $0x10] sm:$0xff]  }
 0x7bf   :  { %3133 = vmatprep.subr.bf16.mxu0 %v3437_v0 }
 0x7c0   :  { %3124 = vmatpush3.bf16.xpose.msra.mxu1 %v1241_v30  ;;  %v3344_v30 = vld [vmem:[%s4208_s2 + $0x48] sm:$0xff]  }
 0x7c1   :  { %3125 = vmatprep.subr.bf16.mxu1 %v3437_v0 }
 0x80a   :  { %v941_v32 = vpop.xlane.xlu0 %940 }
 0x80b   :  { %3379 = vrcp.f32 %v941_v32  ;;  %v1244_v32 = vsel %vm102_vm0, %v3337_v31, 0  ;;  %v1476_v31 = vsel %vm102_vm0, %v3344_v30, 0 }
 0x80c   :  { %3126 = vmatpush3.bf16.xpose.msra.mxu1 %v1244_v32  ;;  %v3345_v32 = vld [vmem:[%s4208_s2 + $0x50] sm:$0xff]  }
 0x80d   :  { %3127 = vmatprep.subr.bf16.mxu1 %v3437_v0 }
 0x80e   :  { %v280_v52 = vpop.xlane.xlu0 %279 }
 0x812   :  { %v944_v33 = vpop.xlane.xlu1 %943 }
 0x813   :  { %3381 = vrcp.f32 %v944_v33  ;;  %v3338_v33 = vld [vmem:[%s4214_s8 + $0x18] sm:$0xff]  }
 0x814   :  { %3383 = vrcp.f32 %v280_v52 }
 0x815   :  { %v3380_v40 = vpop.eup %3379 }
 0x816   :  { %v283_v53 = vpop.xlane.xlu1 %282 }
 0x817   :  { %3385 = vrcp.f32 %v283_v53 }
 0x81d   :  { %v3382_v42 = vpop.eup %3381 }
 0x81e   :  { %v3384_v56 = vpop.eup %3383 }
 0x81f   :  { %v385_v24 = vmul.f32 %v3384_v56, %v3664_v4 }
 0x821   :  { %v3386_v58 = vpop.eup %3385 }
 0x822   :  { %v386_v63 = vmul.f32 %v3386_v58, %v3666_v8  ;;  %v2805_v8 = vld [vmem:[%s4213_s5] ss:$0 sm:$0xff] }
 0x82b   :  { %v3299_v55 = vpop.permute.xlu0 %3298 }
 0x82c   :  { %v3301_v44 = vunpack.i.h.bf16 %v3299_v55  ;;  %v3300_v59 = vunpack.i.l.bf16 %v3299_v55  ;;  %v2810_v55 = vld [vmem:[%s4217_s7] ss:$0 sm:$0xff] }
 0x82e   :  { %v1071_v35 = vsel %vm170_vm2, %v385_v24, %v3300_v59  ;;  %v1072_v1 = vsel %vm170_vm2, %v386_v63, %v3301_v44  ;;  %v3340_v59 = vld [vmem:[%s4215_s10 + $0x8] sm:$0xff]  }
 0x82f   :  { %v3304_v37 = vpop.permute.xlu1 %3303 }
 0x830   :  { %v3306_v60 = vunpack.i.h.bf16 %v3304_v37  ;;  %v3305_v62 = vunpack.i.l.bf16 %v3304_v37 }
 0x832   :  { %v1075_v41 = vsel %vm1073_vm4, %v1072_v1, %v3306_v60  ;;  %v1074_v5 = vsel %vm1073_vm4, %v1071_v35, %v3305_v62  ;;  %v1322_v60 = vsel %vm1314_vm6, %v3340_v59, 0  ;;  %v2811_v62 = vld [vmem:[%s4218_s9] ss:$0 sm:$0xff] }
 0x851   :  { %v989_v34 = vpop.f32.mrb[20].mxu0 }
 0x852   :  { %v3105_v36 = vpop.f32.mrb[21].mxu0  ;;  %v1045_v45 = vmul.f32 %v3380_v40, %v989_v34  ;;  %v1247_v34 = vsel %vm102_vm0, %v3338_v33, 0  ;;  %v1479_v33 = vsel %vm102_vm0, %v3345_v32, 0 }
 0x853   :  { %v992_v38 = vpop.f32.mrb[22].mxu0  ;;  %3128 = vmatpush3.bf16.xpose.msra.mxu1 %v1247_v34  ;;  %v3339_v36 = vld [vmem:[%s4215_s10] sm:$0xff]   ;;  %v3346_v34 = vld [vmem:[%s4208_s2 + $0x58] sm:$0xff]  }
 0x854   :  { %v3106_v39 = vpop.f32.mrb[23].mxu0  ;;  %3157 = vmatprep.subr.bf16.mxu1 %v3437_v0  ;;  %v1319_v38 = vsel %vm1314_vm6, %v3339_v36, 0  ;;  %v1482_v36 = vsel %vm102_vm0, %v3346_v34, 0 }
 0x859   :  { %v1037_v43 = vpop.f32.mrb[40].mxu1 }
 0x85a   :  { %v1046_v46 = vmul.f32 %v3382_v42, %v1037_v43  ;;  %v3111_v47 = vpop.f32.mrb[41].mxu1 }
 0x85b   :  { %v1040_v48 = vpop.f32.mrb[42].mxu1 }
 0x85c   :  { %v3307_v49 = vpack.i.bf16 %v1046_v46, %v1045_v45  ;;  %v3112_v51 = vpop.f32.mrb[43].mxu1 }
 0x85e   :  { %3308 = vrot.lane.b32.xlu1 %v3307_v49, %s4223_s19  ;;  %v2809_v49 = vld [vmem:[%s4216_s6] ss:$0 sm:$0xff] }
 0x8d0   :  { %v3309_v21 = vpop.permute.xlu1 %3308 }
 0x8d1   :  { %v3311_v2 = vunpack.i.h.bf16 %v3309_v21  ;;  %v3310_v3 = vunpack.i.l.bf16 %v3309_v21 }
 0x8d3   :  { %v1078_v6 = vsel %vm1076_vm5, %v1075_v41, %v3311_v2  ;;  %v1077_v7 = vsel %vm1076_vm5, %v1074_v5, %v3310_v3 }
 0x8d4   :  { %v1084_v4 = vpack.c.bf16 %v1078_v6, %v1077_v7  ;;  %v2817_v6 = vld [vmem:[%s4219_s11] ss:$0 sm:$0xff] }
 0x8d6   :  { %3118 = vmatmul.mubr.msk.bf16.vlgmr.msra.gmra.mrb[24].mxu0 %vm102_vm0, %v1084_v4 }
 0x8d7   :  { %3137 = vmatprep.mubr.msk.bf16.mxu0 %vm3438_vm1, %v3437_v0  ;;  %3134 = vmatpush3.bf16.xpose.msra.mxu0 %v1319_v38 }
 0x8d8   :  { %3135 = vmatprep.subr.bf16.mxu0 %v3437_v0 }
 0x8df   :  { %3136 = vmatpush3.bf16.xpose.msra.mxu0 %v1322_v60 }
 0x8e0   :  { %3141 = vmatprep.subr.bf16.mxu0 %v3437_v0 }
 0x9a9   :  { %v1144_v9 = vpop.f32.mrb[24].mxu0 }
 0x9aa   :  { %v1145_v10 = vadd.f32 %v2805_v8, %v1144_v9  ;;  %v3119_v11 = vpop.f32.mrb[25].mxu0 }
 0x9ab   :  { %v1147_v12 = vpop.f32.mrb[26].mxu0 }
 0x9ac   :  { %v1148_v15 = vadd.f32 %v2805_v8, %v1147_v12  ;;  %v3120_v16 = vpop.f32.mrb[27].mxu0  ;;  %v1151_v17 = vadd.f32 %v1145_v10, %v3566_v13 }
 0x9ae   :  { %v1155_v18 = vsel %vm102_vm0, %v1151_v17, 0.0  ;;  %v1152_v57 = vadd.f32 %v1148_v15, %v3571_v14 }
 0x9af   :  { %1156 = vadd.xlane.f32.xlu0 %v1155_v18  ;;  %v3341_v18 = vld [vmem:[%s4208_s2 + $0x30] sm:$0xff]  }
 0x9b0   :  { %v1158_v19 = vsel %vm102_vm0, %v1152_v57, 0.0 }
 0x9b1   :  { %1159 = vadd.xlane.f32.xlu1 %v1158_v19  ;;  %v3342_v19 = vld [vmem:[%s4208_s2 + $0x38] sm:$0xff]  }
 0x9b2   :  { %v1470_v20 = vsel %vm102_vm0, %v3342_v19, 0 }
 0xa3c   :  { %v1157_v23 = vpop.xlane.xlu0 %1156 }
 0xa3d   :  { %v1162_v25 = vmul.f32 0.03125, %v1157_v23  ;;  %v1473_v23 = vsel %vm102_vm0, %v3343_v22, 0 }
 0xa3e   :  { %v1160_v13 = vpop.xlane.xlu1 %1159 }
 0xa3f   :  { %v1164_v26 = vsub.f32 %v1151_v17, %v1162_v25  ;;  %v1163_v27 = vmul.f32 0.03125, %v1160_v13 }
 0xa41   :  { %v1165_v61 = vsub.f32 %v1152_v57, %v1163_v27  ;;  %v1166_v14 = vmul.f32 %v1164_v26, %v1164_v26  ;;  %v1467_v57 = vsel %vm102_vm0, %v3341_v18, 0 }
 0xa43   :  { %v1168_v28 = vsel %vm102_vm0, %v1166_v14, 0.0  ;;  %v1167_v29 = vmul.f32 %v1165_v61, %v1165_v61 }
 0xa44   :  { %1169 = vadd.xlane.f32.xlu0 %v1168_v28 }
 0xa45   :  { %v1171_v50 = vsel %vm102_vm0, %v1167_v29, 0.0 }
 0xa48   :  { %1172 = vadd.xlane.f32.xlu0 %v1171_v50 }
 0xad1   :  { %v1170_v39 = vpop.xlane.xlu0 %1169 }
 0xad2   :  { %v1174_v40 = vmul.f32 0.03125, %v1170_v39 }
 0xad4   :  { %v1176_v42 = vadd.f32 1e-05, %v1174_v40 }
 0xad5   :  { %v1173_v43 = vpop.xlane.xlu0 %1172 }
 0xad6   :  { %3387 = vrsqrt.f32 %v1176_v42  ;;  %v1175_v45 = vmul.f32 0.03125, %v1173_v43 }
 0xad8   :  { %v1177_v46 = vadd.f32 1e-05, %v1175_v45 }
 0xada   :  { %3389 = vrsqrt.f32 %v1177_v46 }
 0xae0   :  { %v3388_v47 = vpop.eup %3387 }
 0xae1   :  { %v1180_v48 = vmul.f32 %v3388_v47, %v1164_v26  ;;  %v2821_v47 = vld [vmem:[%s4220_s12] ss:$0 sm:$0xff] }
 0xae3   :  { %v1188_v52 = vmul.f32 %v2809_v49, %v1180_v48 }
 0xae4   :  { %v3390_v51 = vpop.eup %3389 }
 0xae5   :  { %v1181_v53 = vmul.f32 %v3390_v51, %v1165_v61  ;;  %v1196_v37 = vadd.f32 %v2810_v55, %v1188_v52 }
 0xae7   :  { %v1189_v56 = vmul.f32 %v2809_v49, %v1181_v53  ;;  %v2822_v53 = vld [vmem:[%s4221_s13] ss:$0 sm:$0xff] }
 0xae9   :  { %v1197_v58 = vadd.f32 %v2810_v55, %v1189_v56 }
 0xaeb   :  { %v1207_v44 = vpack.c.bf16 %v1197_v58, %v1196_v37 }
 0xaed   :  { %3130 = vmatmul.mubr.msk.bf16.vlgmr.msra.gmra.mrb[44].mxu1 %vm102_vm0, %v1207_v44  ;;  %v2836_v44 = vld [vmem:[%s4210_s3 + $0x1] ss:$0 sm:$0xff] }
 0xaee   :  { %3159 = vmatprep.mubr.msk.bf16.mxu1 %vm3438_vm1, %v3437_v0 }
 0xbc0   :  { %v1283_v24 = vpop.f32.mrb[44].mxu1 }
 0xbc1   :  { %v1284_v63 = vadd.f32 %v2811_v62, %v1283_v24  ;;  %v3131_v21 = vpop.f32.mrb[45].mxu1 }
 0xbc2   :  { %v1286_v35 = vpop.f32.mrb[46].mxu1 }
 0xbc3   :  { %v1287_v1 = vadd.f32 %v2811_v62, %v1286_v35  ;;  %v3132_v2 = vpop.f32.mrb[47].mxu1  ;;  %v1290_v3 = vmax.f32 %v1284_v63, 0.0 }
 0xbc5   :  { %v1291_v41 = vmax.f32 %v1287_v1, 0.0 }
 0xbc7   :  { %v1297_v5 = vpack.c.bf16 %v1291_v41, %v1290_v3 }
 0xbc9   :  { %3138 = vmatmul.mubr.msk.bf16.vlgmr.msra.gmra.mrb[28].mxu0 %vm1314_vm6, %v1297_v5 }
 0xbca   :  { %3153 = vmatprep.mubr.msk.bf16.mxu0 %vm3438_vm1, %v3437_v0  ;;  %3142 = vmatpush3.bf16.xpose.msra.mxu0 %v1467_v57 }
 0xbcb   :  { %3143 = vmatprep.subr.bf16.mxu0 %v3437_v0 }
 0xbd2   :  { %3144 = vmatpush3.bf16.xpose.msra.mxu0 %v1470_v20 }
 0xbd3   :  { %3145 = vmatprep.subr.bf16.mxu0 %v3437_v0 }
 0xbda   :  { %3146 = vmatpush3.bf16.xpose.msra.mxu0 %v1473_v23 }
 0xbdb   :  { %3147 = vmatprep.subr.bf16.mxu0 %v3437_v0 }
 0xbe2   :  { %3148 = vmatpush3.bf16.xpose.msra.mxu0 %v1476_v31 }
 0xbe3   :  { %3149 = vmatprep.subr.bf16.mxu0 %v3437_v0 }
 0xbea   :  { %3150 = vmatpush3.bf16.xpose.msra.mxu0 %v1479_v33 }
 0xbeb   :  { %3151 = vmatprep.subr.bf16.mxu0 %v3437_v0 }
 0xbf2   :  { %3152 = vmatpush3.bf16.xpose.msra.mxu0 %v1482_v36 }
 0xbf3   :  { %3193 = vmatprep.subr.bf16.mxu0 %v3437_v0 }
 0xc9c   :  { %v1358_v7 = vpop.f32.mrb[28].mxu0 }
 0xc9d   :  { %v1359_v4 = vadd.f32 %v2817_v6, %v1358_v7  ;;  %v3139_v8 = vpop.f32.mrb[29].mxu0  ;;  %v3938_v7 = vld [vmem:[%s4211_s1] sm:$0xff] }
 0xc9e   :  { %v1361_v9 = vpop.f32.mrb[30].mxu0 }
 0xc9f   :  { %v1362_v10 = vadd.f32 %v2817_v6, %v1361_v9  ;;  %v3140_v11 = vpop.f32.mrb[31].mxu0  ;;  %v1365_v12 = vadd.f32 %v1359_v4, %v1196_v37 }
 0xca1   :  { %v1369_v15 = vsel %vm102_vm0, %v1365_v12, 0.0  ;;  %v1366_v16 = vadd.f32 %v1362_v10, %v1197_v58 }
 0xca2   :  { %1370 = vadd.xlane.f32.xlu1 %v1369_v15  ;;  %v3945_v15 = vld [vmem:[%s4211_s1 + $0x8] sm:$0xff]  ;;  %s4226_s1 = smov 8  }
 0xca3   :  { %v1372_v17 = vsel %vm102_vm0, %v1366_v16, 0.0 }
 0xca4   :  { %1373 = vadd.xlane.f32.xlu0 %v1372_v17 }
 0xd2f   :  { %v1371_v25 = vpop.xlane.xlu1 %1370 }
 0xd30   :  { %v1375_v13 = vmul.f32 0.03125, %v1371_v25 }
 0xd31   :  { %v1374_v26 = vpop.xlane.xlu0 %1373 }
 0xd32   :  { %v1377_v27 = vsub.f32 %v1365_v12, %v1375_v13  ;;  %v1376_v61 = vmul.f32 0.03125, %v1374_v26 }
 0xd34   :  { %v1378_v14 = vsub.f32 %v1366_v16, %v1376_v61  ;;  %v1379_v28 = vmul.f32 %v1377_v27, %v1377_v27 }
 0xd36   :  { %v1381_v29 = vsel %vm102_vm0, %v1379_v28, 0.0  ;;  %v1380_v50 = vmul.f32 %v1378_v14, %v1378_v14 }
 0xd37   :  { %1382 = vadd.xlane.f32.xlu1 %v1381_v29 }
 0xd38   :  { %v1384_v54 = vsel %vm102_vm0, %v1380_v50, 0.0 }
 0xd39   :  { %1385 = vadd.xlane.f32.xlu0 %v1384_v54 }
 0xdc4   :  { %v1383_v38 = vpop.xlane.xlu1 %1382 }
 0xdc5   :  { %v1387_v39 = vmul.f32 0.03125, %v1383_v38 }
 0xdc6   :  { %v1386_v40 = vpop.xlane.xlu0 %1385 }
 0xdc7   :  { %v1389_v42 = vadd.f32 1e-05, %v1387_v39  ;;  %v1388_v43 = vmul.f32 0.03125, %v1386_v40 }
 0xdc9   :  { %3391 = vrsqrt.f32 %v1389_v42  ;;  %v1390_v45 = vadd.f32 1e-05, %v1388_v43 }
 0xdcb   :  { %3393 = vrsqrt.f32 %v1390_v45 }
 0xdd3   :  { %v3392_v46 = vpop.eup %3391 }
 0xdd4   :  { %v1393_v48 = vmul.f32 %v3392_v46, %v1377_v27 }
 0xdd5   :  { %v3394_v49 = vpop.eup %3393 }
 0xdd6   :  { %v1401_v51 = vmul.f32 %v2821_v47, %v1393_v48  ;;  %v1394_v52 = vmul.f32 %v3394_v49, %v1378_v14 }
 0xdd8   :  { %v1402_v55 = vmul.f32 %v2821_v47, %v1394_v52  ;;  %v3903_v56 = vadd.f32 %v2822_v53, %v1401_v51 }
 0xdda   :  { %v3905_v37 = vadd.f32 %v2822_v53, %v1402_v55 }
 0xddc   :  { %v1426_v58 = vpack.c.bf16 %v3905_v37, %v3903_v56 }
 0xdde   :  { %3154 = vmatmul.mubr.msk.bf16.vlgmr.msra.gmra.mrb[32].mxu0 %vm102_vm0, %v1426_v58 }
 0xddf   :  { %3195 = vmatprep.mubr.msk.bf16.mxu0 %vm3438_vm1, %v3437_v0 }
 0xeb1   :  { %v1518_v59 = vpop.f32.mrb[32].mxu0 }
 0xeb2   :  { %v1519_v60 = vadd.f32 %v2836_v44, %v1518_v59  ;;  %v3155_v62 = vpop.f32.mrb[33].mxu0 }
 0xeb3   :  { %v1521_v24 = vpop.f32.mrb[34].mxu0 }
 0xeb4   :  { %v3915_v63 = vpack.c.bf16 %v1519_v60, %v1519_v60  ;;  %v1522_v21 = vadd.f32 %v2836_v44, %v1521_v24  ;;  %v3156_v35 = vpop.f32.mrb[35].mxu0 }
 0xeb6   :  { %v3917_v1 = vpack.c.bf16 %v1522_v21, %v1522_v21  ;;  %1528 = vrot.lane.b32.xlu1 %v3915_v63, %s3439_s0 }
 0xeb8   :  { %1577 = vrot.lane.b32.xlu0 %v3917_v1, %s3439_s0 }
 0xf28   :  { %v1529_v2 = vpop.permute.xlu1 %1528 }
 0xf29   :  { %v1534_v3 = vsel %vm170_vm2, %v1529_v2, 0 }
 0xf2a   :  { %3158 = vmatpush3.bf16.xpose.msra.mxu1 %v1534_v3  ;;  %v1578_v41 = vpop.permute.xlu0 %1577 }
 0xf2b   :  { %3163 = vmatprep.subr.bf16.mxu1 %v3437_v0  ;;  %v1583_v5 = vsel %vm170_vm2, %v1578_v41, 0 }
 0xf31   :  { %3160 = vmatmul.mubr.msk.bf16.vlgmr.msra.gmra.mrb[48].mxu1 %vm170_vm2, %v3915_v63 }
 0xf32   :  { %3164 = vmatpush3.bf16.xpose.msra.mxu1 %v1583_v5  ;;  %3165 = vmatprep.mubr.msk.bf16.mxu1 %vm3438_vm1, %v3437_v0 }
 0xf33   :  { %3169 = vmatprep.subr.bf16.mxu1 %v3437_v0 }
 0xf39   :  { %3166 = vmatmul.mubr.msk.bf16.vlgmr.msra.gmra.mrb[52].mxu1 %vm170_vm2, %v3917_v1 }
 0xf3a   :  { %3171 = vmatprep.mubr.msk.bf16.mxu1 %vm3438_vm1, %v3437_v0 }
0x1004   :  { %v1570_v6 = vpop.f32.mrb[48].mxu1 }
0x1005   :  { %v1571_v4 = vadd.f32 %v3938_v7, %v1570_v6  ;;  %v3161_v8 = vpop.f32.mrb[49].mxu1 }
0x1006   :  { %v1573_v9 = vpop.f32.mrb[50].mxu1 }
0x1007   :  { %v3162_v10 = vpop.f32.mrb[51].mxu1  ;;  %v1625_v11 = vsel %vm170_vm2, %v1571_v4, -inf }
0x1008   :  { %1626 = vmax.xlane.f32.xlu1 %v1625_v11 }
0x100c   :  { %v1619_v12 = vpop.f32.mrb[52].mxu1 }
0x100d   :  { %v1620_v16 = vadd.f32 %v3945_v15, %v1619_v12  ;;  %v3167_v17 = vpop.f32.mrb[53].mxu1 }
0x100e   :  { %v1622_v18 = vpop.f32.mrb[54].mxu1 }
0x100f   :  { %v3168_v57 = vpop.f32.mrb[55].mxu1  ;;  %v1628_v19 = vsel %vm170_vm2, %v1620_v16, -inf }
0x1010   :  { %1629 = vmax.xlane.f32.xlu0 %v1628_v19 }
0x1019   :  { %1645 = vrot.lane.b32.xlu1 %v3915_v63, %s3440_s15 }
0x101d   :  { %1747 = vrot.lane.b32.xlu1 %v3915_v63, %s3441_s16 }
0x1021   :  { %1745 = vrot.lane.b32.xlu1 %v3915_v63, %s3442_s17 }
0x1025   :  { %1795 = vrot.lane.b32.xlu1 %v3917_v1, %s3442_s17 }
0x1026   :  { %1693 = vrot.lane.b32.xlu0 %v3917_v1, %s3440_s15  ;;  %s4227_s15 = smov 16  }
0x1029   :  { %1913 = vrot.lane.b32.xlu1 %v3917_v1, %s3443_s18 }
0x102a   :  { %1797 = vrot.lane.b32.xlu0 %v3917_v1, %s3441_s16 }
0x102e   :  { %1865 = vrot.lane.b32.xlu0 %v3915_v63, %s3443_s18 }
0x1095   :  { %v1627_v20 = vpop.xlane.xlu1 %1626 }
0x1096   :  { %v1631_v22 = vsub.f32 %v1571_v4, %v1627_v20 }
0x1098   :  { %v1633_v23 = vmul.f32 1.442695, %v1631_v22 }
0x1099   :  { %v1646_v25 = vpop.permute.xlu1 %1645 }
0x109a   :  { %3395 = vpow2.f32 %v1633_v23  ;;  %v1651_v13 = vsel %vm291_vm3, %v1646_v25, 0 }
0x109b   :  { %3170 = vmatpush3.bf16.msra.mxu1 %v1651_v13 }
0x109c   :  { %3175 = vmatprep.subr.bf16.mxu1 %v3437_v0 }
0x109d   :  { %v1630_v26 = vpop.xlane.xlu0 %1629  ;;  %v1748_v32 = vpop.permute.xlu1 %1747 }
0x109e   :  { %v1632_v27 = vsub.f32 %v1620_v16, %v1630_v26  ;;  %v1753_v36 = vsel %vm170_vm2, %v1748_v32, 0 }
0x10a0   :  { %v1635_v61 = vmul.f32 1.442695, %v1632_v27 }
0x10a1   :  { %v1694_v14 = vpop.permute.xlu0 %1693  ;;  %v1746_v38 = vpop.permute.xlu1 %1745 }
0x10a2   :  { %3397 = vpow2.f32 %v1635_v61  ;;  %v1699_v54 = vsel %vm291_vm3, %v1694_v14, 0 }
0x10a4   :  { %v3967_v28 = vpop.eup %3395 }
0x10a5   :  { %v1798_v29 = vpop.permute.xlu0 %1797  ;;  %v1643_v50 = vpack.c.bf16 %v3967_v28, %v3967_v28  ;;  %v1796_v39 = vpop.permute.xlu1 %1795 }
0x10a6   :  { %v1803_v40 = vsel %vm170_vm2, %v1798_v29, 0 }
0x10a7   :  { %3172 = vmatmul.mubr.msk.bf16.vlgmr.msra.gmra.mrb[56].mxu1 %vm170_vm2, %v1643_v50 }
0x10a8   :  { %3176 = vmatpush3.bf16.msra.mxu1 %v1699_v54  ;;  %3177 = vmatprep.mubr.msk.bf16.mxu1 %vm3438_vm1, %v3437_v0 }
0x10a9   :  { %v1866_v30 = vpop.permute.xlu0 %1865  ;;  %3181 = vmatprep.subr.bf16.mxu1 %v3437_v0  ;;  %v1914_v42 = vpop.permute.xlu1 %1913 }
0x10aa   :  { %v1871_v31 = vsel %vm291_vm3, %v1866_v30, 0  ;;  %v1919_v43 = vsel %vm291_vm3, %v1914_v42, 0 }
0x10ab   :  { %3194 = vmatpush3.bf16.msra.mxu0 %v1871_v31 }
0x10ac   :  { %v3977_v33 = vpop.eup %3397  ;;  %3205 = vmatprep.subr.bf16.mxu0 %v3437_v0 }
0x10ad   :  { %v1644_v34 = vpack.c.bf16 %v3977_v33, %v3977_v33 }
0x10af   :  { %3178 = vmatmul.mubr.msk.bf16.vlgmr.msra.gmra.mrb[60].mxu1 %vm170_vm2, %v1644_v34 }
0x10b0   :  { %3183 = vmatprep.mubr.msk.bf16.mxu1 %vm3438_vm1, %v3437_v0 }
0x10b1   :  { %3182 = vmatpush3.bf16.xpose.msra.mxu1 %v1753_v36 }
0x10b2   :  { %3187 = vmatprep.subr.bf16.mxu1 %v3437_v0 }
0x10b8   :  { %3184 = vmatmul.mubr.msk.bf16.vlgmr.msra.gmra.mrb[64].mxu1 %vm170_vm2, %v1746_v38 }
0x10b9   :  { %3188 = vmatpush3.bf16.xpose.msra.mxu1 %v1803_v40  ;;  %3189 = vmatprep.mubr.msk.bf16.mxu1 %vm3438_vm1, %v3437_v0 }
0x10ba   :  { %3199 = vmatprep.subr.bf16.mxu1 %v3437_v0 }
0x10c0   :  { %3190 = vmatmul.mubr.msk.bf16.vlgmr.msra.gmra.mrb[68].mxu1 %vm170_vm2, %v1796_v39 }
0x10c1   :  { %3200 = vmatpush3.bf16.msra.mxu1 %v1919_v43  ;;  %3201 = vmatprep.mubr.msk.bf16.mxu1 %vm3438_vm1, %v3437_v0 }
0x10c2   :  { %3211 = vmatprep.subr.bf16.mxu1 %v3437_v0 }
0x117a   :  { %v3997_v45 = vpop.f32.mrb[56].mxu1 }
0x117b   :  { %v3173_v46 = vpop.f32.mrb[57].mxu1 }
0x117c   :  { %v1690_v47 = vpop.f32.mrb[58].mxu1 }
0x117d   :  { %v3174_v48 = vpop.f32.mrb[59].mxu1 }
0x1182   :  { %v3999_v49 = vpop.f32.mrb[60].mxu1 }
0x1183   :  { %v3179_v51 = vpop.f32.mrb[61].mxu1 }
0x1184   :  { %v1738_v52 = vpop.f32.mrb[62].mxu1 }
0x1185   :  { %v3180_v53 = vpop.f32.mrb[63].mxu1 }
0x118b   :  { %v1789_v55 = vpop.f32.mrb[64].mxu1 }
0x118c   :  { %v1790_v58 = vadd.f32 %v3938_v7, %v1789_v55  ;;  %v3185_v44 = vpop.f32.mrb[65].mxu1 }
0x118d   :  { %v1792_v59 = vpop.f32.mrb[66].mxu1 }
0x118e   :  { %v3186_v60 = vpop.f32.mrb[67].mxu1  ;;  %v1845_v62 = vsel %vm170_vm2, %v1790_v58, -inf }
0x118f   :  { %1846 = vmax.xlane.f32.xlu0 %v1845_v62 }
0x1193   :  { %v1839_v24 = vpop.f32.mrb[68].mxu1 }
0x1194   :  { %v1840_v21 = vadd.f32 %v3945_v15, %v1839_v24  ;;  %v3191_v35 = vpop.f32.mrb[69].mxu1 }
0x1195   :  { %v1842_v2 = vpop.f32.mrb[70].mxu1 }
0x1196   :  { %v3192_v3 = vpop.f32.mrb[71].mxu1  ;;  %v1848_v41 = vsel %vm170_vm2, %v1840_v21, -inf }
0x1197   :  { %1849 = vmax.xlane.f32.xlu1 %v1848_v41 }
0x11a5   :  { %1967 = vrot.lane.b32.xlu0 %v3915_v63, %s3444_s23 }
0x11a8   :  { %2017 = vrot.lane.b32.xlu1 %v3917_v1, %s3444_s23 }
0x11a9   :  { %1965 = vrot.lane.b32.xlu0 %v3915_v63, %s3445_s24 }
0x11ac   :  { %2015 = vrot.lane.b32.xlu1 %v3917_v1, %s3445_s24 }
0x11ad   :  { %2085 = vrot.lane.b32.xlu0 %v3915_v63, %s3446_s25 }
0x11b0   :  { %2133 = vrot.lane.b32.xlu1 %v3917_v1, %s3446_s25 }
0x121c   :  { %v1847_v5 = vpop.xlane.xlu0 %1846 }
0x121d   :  { %v1851_v6 = vsub.f32 %v1790_v58, %v1847_v5 }
0x121f   :  { %v1853_v4 = vmul.f32 1.442695, %v1851_v6 }
0x1220   :  { %v1968_v10 = vpop.permute.xlu0 %1967 }
0x1221   :  { %3399 = vpow2.f32 %v1853_v4  ;;  %v1973_v18 = vsel %vm170_vm2, %v1968_v10, 0 }
0x1224   :  { %v1850_v8 = vpop.xlane.xlu1 %1849  ;;  %v1966_v17 = vpop.permute.xlu0 %1965 }
0x1225   :  { %v1852_v9 = vsub.f32 %v1840_v21, %v1850_v8 }
0x1227   :  { %v1855_v11 = vmul.f32 1.442695, %v1852_v9 }
0x1228   :  { %v2018_v57 = vpop.permute.xlu1 %2017  ;;  %v2086_v20 = vpop.permute.xlu0 %2085 }
0x1229   :  { %3401 = vpow2.f32 %v1855_v11  ;;  %v2091_v25 = vsel %vm291_vm3, %v2086_v20, 0  ;;  %v2023_v13 = vsel %vm170_vm2, %v2018_v57, 0 }
0x122b   :  { %v4017_v12 = vpop.eup %3399 }
0x122c   :  { %v1863_v16 = vpack.c.bf16 %v4017_v12, %v4017_v12  ;;  %v2016_v23 = vpop.permute.xlu1 %2015 }
0x122e   :  { %3196 = vmatmul.mubr.msk.bf16.vlgmr.msra.gmra.mrb[36].mxu0 %vm170_vm2, %v1863_v16 }
0x122f   :  { %3206 = vmatpush3.bf16.xpose.msra.mxu0 %v1973_v18  ;;  %3207 = vmatprep.mubr.msk.bf16.mxu0 %vm3438_vm1, %v3437_v0 }
0x1230   :  { %3217 = vmatprep.subr.bf16.mxu0 %v3437_v0  ;;  %v2134_v26 = vpop.permute.xlu1 %2133 }
0x1231   :  { %v2139_v27 = vsel %vm291_vm3, %v2134_v26, 0 }
0x1233   :  { %v4026_v19 = vpop.eup %3401 }
0x1234   :  { %v1864_v22 = vpack.c.bf16 %v4026_v19, %v4026_v19 }
0x1236   :  { %3202 = vmatmul.mubr.msk.bf16.vlgmr.msra.gmra.mrb[72].mxu1 %vm170_vm2, %v1864_v22  ;;  %3208 = vmatmul.mubr.msk.bf16.vlgmr.msra.gmra.mrb[40].mxu0 %vm170_vm2, %v1966_v17 }
0x1237   :  { %3212 = vmatpush3.bf16.xpose.msra.mxu1 %v2023_v13  ;;  %3218 = vmatpush3.bf16.msra.mxu0 %v2091_v25 }
0x1238   :  { %3213 = vmatprep.mubr.msk.bf16.mxu1 %vm3438_vm1, %v3437_v0  ;;  %3223 = vmatprep.subr.bf16.mxu1 %v3437_v0 }
0x1239   :  { %3219 = vmatprep.mubr.msk.bf16.mxu0 %vm3438_vm1, %v3437_v0  ;;  %3229 = vmatprep.subr.bf16.mxu0 %v3437_v0 }
0x123e   :  { %3214 = vmatmul.mubr.msk.bf16.vlgmr.msra.gmra.mrb[76].mxu1 %vm170_vm2, %v2016_v23 }
0x123f   :  { %3224 = vmatpush3.bf16.msra.mxu1 %v2139_v27  ;;  %3225 = vmatprep.mubr.msk.bf16.mxu1 %vm3438_vm1, %v3437_v0 }
0x1240   :  { %3235 = vmatprep.subr.bf16.mxu1 %v3437_v0 }
0x1301   :  { %v4045_v61 = vpop.f32.mrb[36].mxu0 }
0x1302   :  { %v3197_v14 = vpop.f32.mrb[37].mxu0 }
0x1303   :  { %v1910_v29 = vpop.f32.mrb[38].mxu0 }
0x1304   :  { %v3198_v50 = vpop.f32.mrb[39].mxu0 }
0x1309   :  { %v4047_v54 = vpop.f32.mrb[72].mxu1  ;;  %v2009_v30 = vpop.f32.mrb[40].mxu0 }
0x130a   :  { %v2010_v31 = vadd.f32 %v3938_v7, %v2009_v30  ;;  %v3203_v32 = vpop.f32.mrb[73].mxu1  ;;  %v3209_v34 = vpop.f32.mrb[41].mxu0 }
0x130b   :  { %v1958_v36 = vpop.f32.mrb[74].mxu1  ;;  %v2012_v38 = vpop.f32.mrb[42].mxu0 }
0x130c   :  { %v3204_v39 = vpop.f32.mrb[75].mxu1  ;;  %v3210_v40 = vpop.f32.mrb[43].mxu0  ;;  %v2065_v42 = vsel %vm170_vm2, %v2010_v31, -inf }
0x130d   :  { %2066 = vmax.xlane.f32.xlu0 %v2065_v42 }
0x1311   :  { %v2059_v43 = vpop.f32.mrb[76].mxu1 }
0x1312   :  { %v2060_v46 = vadd.f32 %v3945_v15, %v2059_v43  ;;  %v3215_v47 = vpop.f32.mrb[77].mxu1 }
0x1313   :  { %v2062_v48 = vpop.f32.mrb[78].mxu1 }
0x1314   :  { %v3216_v51 = vpop.f32.mrb[79].mxu1  ;;  %v2068_v52 = vsel %vm170_vm2, %v2060_v46, -inf }
0x1315   :  { %2069 = vmax.xlane.f32.xlu1 %v2068_v52  ;;  %v1637_v51 = vsel %vm170_vm2, %v3967_v28, 0.0 }
0x1323   :  { %2187 = vrot.lane.b32.xlu0 %v3915_v63, %s3447_s26 }
0x1326   :  { %2237 = vrot.lane.b32.xlu1 %v3917_v1, %s3447_s26 }
0x1327   :  { %2185 = vrot.lane.b32.xlu0 %v3915_v63, %s3448_s27 }
0x132a   :  { %2235 = vrot.lane.b32.xlu1 %v3917_v1, %s3448_s27 }
0x139a   :  { %v2067_v53 = vpop.xlane.xlu0 %2066 }
0x139b   :  { %v2071_v55 = vsub.f32 %v2010_v31, %v2067_v53 }
0x139d   :  { %v2073_v58 = vmul.f32 1.442695, %v2071_v55 }
0x139e   :  { %v2188_v24 = vpop.permute.xlu0 %2187 }
0x139f   :  { %3403 = vpow2.f32 %v2073_v58  ;;  %v2193_v35 = vsel %vm170_vm2, %v2188_v24, 0  ;;  %v1640_v58 = vsel %vm170_vm2, %v3977_v33, 0.0 }
0x13a2   :  { %v2070_v44 = vpop.xlane.xlu1 %2069  ;;  %v2186_v5 = vpop.permute.xlu0 %2185 }
0x13a3   :  { %v2072_v59 = vsub.f32 %v2060_v46, %v2070_v44 }
0x13a5   :  { %v2075_v60 = vmul.f32 1.442695, %v2072_v59 }
0x13a6   :  { %v2238_v3 = vpop.permute.xlu1 %2237 }
0x13a7   :  { %3405 = vpow2.f32 %v2075_v60  ;;  %v2243_v6 = vsel %vm170_vm2, %v2238_v3, 0 }
0x13a9   :  { %v3404_v62 = vpop.eup %3403 }
0x13aa   :  { %v2083_v21 = vpack.c.bf16 %v3404_v62, %v3404_v62  ;;  %v2236_v4 = vpop.permute.xlu1 %2235  ;;  %v2077_v32 = vsel %vm170_vm2, %v3404_v62, 0.0 }
0x13ac   :  { %3220 = vmatmul.mubr.msk.bf16.vlgmr.msra.gmra.mrb[44].mxu0 %vm170_vm2, %v2083_v21 }
0x13ad   :  { %3230 = vmatpush3.bf16.xpose.msra.mxu0 %v2193_v35  ;;  %3231 = vmatprep.mubr.msk.bf16.mxu0 %vm3438_vm1, %v3437_v0 }
0x13ae   :  { %3241 = vmatprep.subr.bf16.mxu0 %v3437_v0 }
0x13b1   :  { %v3406_v2 = vpop.eup %3405 }
0x13b2   :  { %v2084_v41 = vpack.c.bf16 %v3406_v2, %v3406_v2  ;;  %v2080_v34 = vsel %vm170_vm2, %v3406_v2, 0.0 }
0x13b4   :  { %3226 = vmatmul.mubr.msk.bf16.vlgmr.msra.gmra.mrb[80].mxu1 %vm170_vm2, %v2084_v41  ;;  %3232 = vmatmul.mubr.msk.bf16.vlgmr.msra.gmra.mrb[48].mxu0 %vm170_vm2, %v2186_v5 }
0x13b5   :  { %3236 = vmatpush3.bf16.xpose.msra.mxu1 %v2243_v6  ;;  %3237 = vmatprep.mubr.msk.bf16.mxu1 %vm3438_vm1, %v3437_v0 }
0x13b6   :  { %3247 = vmatprep.subr.bf16.mxu1 %v3437_v0  ;;  %3243 = vmatprep.mubr.msk.bf16.mxu0 %vm3438_vm1, %v3437_v0 }
0x13bc   :  { %3238 = vmatmul.mubr.msk.bf16.vlgmr.msra.gmra.mrb[84].mxu1 %vm170_vm2, %v2236_v4  ;;  %v3347_v4 = vld [vmem:[%s4212_s4 + $0x10] sm:$0xff]  }
0x13bd   :  { %3249 = vmatprep.mubr.msk.bf16.mxu1 %vm3438_vm1, %v3437_v0 }
0x147f   :  { %v4077_v8 = vpop.f32.mrb[44].mxu0 }
0x1480   :  { %v3221_v9 = vpop.f32.mrb[45].mxu0 }
0x1481   :  { %v2130_v10 = vpop.f32.mrb[46].mxu0  ;;  %v2463_v9 = vsel %vm102_vm0, %v3347_v4, 0 }
0x1482   :  { %v3222_v11 = vpop.f32.mrb[47].mxu0 }
0x1487   :  { %v4079_v16 = vpop.f32.mrb[80].mxu1  ;;  %v2229_v17 = vpop.f32.mrb[48].mxu0 }
0x1488   :  { %v2230_v18 = vadd.f32 %v3938_v7, %v2229_v17  ;;  %v3227_v57 = vpop.f32.mrb[81].mxu1  ;;  %v3233_v20 = vpop.f32.mrb[49].mxu0  ;;  %v1857_v7 = vsel %vm170_vm2, %v4017_v12, 0.0 }
0x1489   :  { %v2178_v22 = vpop.f32.mrb[82].mxu1  ;;  %v2232_v23 = vpop.f32.mrb[50].mxu0 }
0x148a   :  { %v3228_v25 = vpop.f32.mrb[83].mxu1  ;;  %v3234_v13 = vpop.f32.mrb[51].mxu0  ;;  %v2285_v26 = vsel %vm170_vm2, %v2230_v18, -inf }
0x148b   :  { %2286 = vmax.xlane.f32.xlu0 %v2285_v26 }
0x148f   :  { %v2279_v27 = vpop.f32.mrb[84].mxu1 }
0x1490   :  { %v2280_v14 = vadd.f32 %v3945_v15, %v2279_v27  ;;  %v3239_v29 = vpop.f32.mrb[85].mxu1  ;;  %v1860_v15 = vsel %vm170_vm2, %v4026_v19, 0.0 }
0x1491   :  { %v2282_v50 = vpop.f32.mrb[86].mxu1 }
0x1492   :  { %v3240_v30 = vpop.f32.mrb[87].mxu1  ;;  %v2288_v31 = vsel %vm170_vm2, %v2280_v14, -inf }
0x1493   :  { %2289 = vmax.xlane.f32.xlu1 %v2288_v31 }
0x14a1   :  { %2305 = vrot.lane.b32.xlu0 %v3915_v63, %s3449_s28 }
0x14a4   :  { %2353 = vrot.lane.b32.xlu1 %v3917_v1, %s3449_s28 }
0x14c0   :  { %1858 = vadd.xlane.f32.xlu0 %v1857_v7 }
0x14c4   :  { %2078 = vadd.xlane.f32.xlu0 %v2077_v32 }
0x14c8   :  { %1861 = vadd.xlane.f32.xlu1 %v1860_v15  ;;  %2081 = vadd.xlane.f32.xlu0 %v2080_v34 }
0x1518   :  { %v2287_v36 = vpop.xlane.xlu0 %2286 }
0x1519   :  { %v2291_v38 = vsub.f32 %v2230_v18, %v2287_v36 }
0x151b   :  { %v2293_v63 = vmul.f32 1.442695, %v2291_v38 }
0x151c   :  { %v2306_v39 = vpop.permute.xlu0 %2305 }
0x151d   :  { %3407 = vpow2.f32 %v2293_v63  ;;  %v2311_v1 = vsel %vm291_vm3, %v2306_v39, 0 }
0x151e   :  { %3242 = vmatpush3.bf16.msra.mxu0 %v2311_v1 }
0x151f   :  { %3253 = vmatprep.subr.bf16.mxu0 %v3437_v0 }
0x1520   :  { %v2290_v12 = vpop.xlane.xlu1 %2289 }
0x1521   :  { %v2292_v40 = vsub.f32 %v2280_v14, %v2290_v12 }
0x1523   :  { %v2295_v42 = vmul.f32 1.442695, %v2292_v40 }
0x1524   :  { %v2354_v43 = vpop.permute.xlu1 %2353 }
0x1525   :  { %3409 = vpow2.f32 %v2295_v42  ;;  %v2359_v19 = vsel %vm291_vm3, %v2354_v43, 0 }
0x1526   :  { %3248 = vmatpush3.bf16.msra.mxu1 %v2359_v19 }
0x1527   :  { %v3408_v46 = vpop.eup %3407  ;;  %3261 = vmatprep.subr.bf16.mxu1 %v3437_v0 }
0x1528   :  { %v2297_v47 = vsel %vm170_vm2, %v3408_v46, 0.0  ;;  %v2303_v48 = vpack.c.bf16 %v3408_v46, %v3408_v46 }
0x1529   :  { %2298 = vadd.xlane.f32.xlu1 %v2297_v47 }
0x152a   :  { %3244 = vmatmul.mubr.msk.bf16.vlgmr.msra.gmra.mrb[52].mxu0 %vm170_vm2, %v2303_v48 }
0x152b   :  { %3257 = vmatprep.mubr.msk.bf16.mxu0 %vm3438_vm1, %v3437_v0  ;;  %3254 = vmatpush3.bf16.xpose.msra.mxu0 %v2463_v9  ;;  %v3350_v9 = vld [vmem:[%s4214_s8 + $0x28] sm:$0xff]  }
0x152c   :  { %3255 = vmatprep.subr.bf16.mxu0 %v3437_v0 }
0x152d   :  { %1638 = vadd.xlane.f32.xlu1 %v1637_v51 }
0x152f   :  { %v3410_v52 = vpop.eup %3409 }
0x1530   :  { %v2300_v53 = vsel %vm170_vm2, %v3410_v52, 0.0  ;;  %v2304_v55 = vpack.c.bf16 %v3410_v52, %v3410_v52 }
0x1531   :  { %2301 = vadd.xlane.f32.xlu0 %v2300_v53 }
0x1532   :  { %3250 = vmatmul.mubr.msk.bf16.vlgmr.msra.gmra.mrb[88].mxu1 %vm170_vm2, %v2304_v55 }
0x1533   :  { %3269 = vmatprep.mubr.msk.bf16.mxu1 %vm3438_vm1, %v3437_v0 }
0x1535   :  { %1641 = vadd.xlane.f32.xlu0 %v1640_v58 }
0x154d   :  { %v1859_v44 = vpop.xlane.xlu0 %1858 }
0x154e   :  { %3411 = vrcp.f32 %v1859_v44 }
0x1551   :  { %v2079_v59 = vpop.xlane.xlu0 %2078 }
0x1552   :  { %3413 = vrcp.f32 %v2079_v59 }
0x1555   :  { %v1862_v28 = vpop.xlane.xlu1 %1861  ;;  %v2082_v60 = vpop.xlane.xlu0 %2081 }
0x1556   :  { %3415 = vrcp.f32 %v1862_v28 }
0x1557   :  { %3417 = vrcp.f32 %v2082_v60 }
0x1558   :  { %v3412_v62 = vpop.eup %3411 }
0x1559   :  { %v1963_v2 = vmul.f32 %v3412_v62, %v4045_v61  ;;  %v3348_v61 = vld [vmem:[%s4212_s4 + $0x18] sm:$0xff]   ;;  %s4228_s4 = smov 24  }
0x155c   :  { %v3414_v24 = vpop.eup %3413 }
0x155d   :  { %v2183_v41 = vmul.f32 %v3414_v24, %v4077_v8  ;;  %v3349_v24 = vld [vmem:[%s4214_s8 + $0x20] sm:$0xff]  }
0x1560   :  { %v3416_v21 = vpop.eup %3415 }
0x1561   :  { %v3418_v35 = vpop.eup %3417  ;;  %v1964_v3 = vmul.f32 %v3416_v21, %v4047_v54  ;;  %v2466_v54 = vsel %vm102_vm0, %v3348_v61, 0  ;;  %v2599_v21 = vsel %vm102_vm0, %v3349_v24, 0  ;;  %v2602_v61 = vsel %vm102_vm0, %v3350_v9, 0 }
0x1562   :  { %v2184_v33 = vmul.f32 %v3418_v35, %v4079_v16  ;;  %3256 = vmatpush3.bf16.xpose.msra.mxu0 %v2466_v54  ;;  %3262 = vmatpush3.bf16.xpose.msra.mxu1 %v2599_v21  ;;  %v3351_v54 = vld [vmem:[%s4214_s8 + $0x30] sm:$0xff]  }
0x1563   :  { %v3312_v5 = vpack.i.bf16 %v1964_v3, %v1963_v2  ;;  %3273 = vmatprep.subr.bf16.mxu0 %v3437_v0  ;;  %3263 = vmatprep.subr.bf16.mxu1 %v3437_v0 }
0x1564   :  { %v3317_v6 = vpack.i.bf16 %v2184_v33, %v2183_v41 }
0x1565   :  { %3313 = vrot.lane.b32.xlu1 %v3312_v5, %s4226_s1 }
0x1566   :  { %3318 = vrot.lane.b32.xlu0 %v3317_v6, %s4227_s15 }
0x156a   :  { %3264 = vmatpush3.bf16.xpose.msra.mxu1 %v2602_v61  ;;  %v2899_v61 = vld [vmem:[%s4220_s12 + $0x1] ss:$0 sm:$0xff] }
0x156b   :  { %3265 = vmatprep.subr.bf16.mxu1 %v3437_v0 }
0x15b6   :  { %v2299_v8 = vpop.xlane.xlu1 %2298 }
0x15b7   :  { %3419 = vrcp.f32 %v2299_v8  ;;  %v2605_v8 = vsel %vm102_vm0, %v3351_v54, 0 }
0x15b8   :  { %3266 = vmatpush3.bf16.xpose.msra.mxu1 %v2605_v8 }
0x15b9   :  { %3267 = vmatprep.subr.bf16.mxu1 %v3437_v0 }
0x15ba   :  { %v1639_v29 = vpop.xlane.xlu1 %1638 }
0x15be   :  { %v2302_v10 = vpop.xlane.xlu0 %2301 }
0x15bf   :  { %3421 = vrcp.f32 %v2302_v10  ;;  %v3352_v10 = vld [vmem:[%s4214_s8 + $0x38] sm:$0xff]  }
0x15c0   :  { %3423 = vrcp.f32 %v1639_v29 }
0x15c1   :  { %v3420_v57 = vpop.eup %3419 }
0x15c2   :  { %v1642_v50 = vpop.xlane.xlu0 %1641 }
0x15c3   :  { %3425 = vrcp.f32 %v1642_v50 }
0x15c9   :  { %v3422_v20 = vpop.eup %3421 }
0x15ca   :  { %v3424_v31 = vpop.eup %3423 }
0x15cb   :  { %v1743_v36 = vmul.f32 %v3424_v31, %v3997_v45 }
0x15cd   :  { %v3426_v7 = vpop.eup %3425 }
0x15ce   :  { %v1744_v38 = vmul.f32 %v3426_v7, %v3999_v49  ;;  %v2865_v49 = vld [vmem:[%s4213_s5 + $0x1] ss:$0 sm:$0xff] }
0x15d7   :  { %v3314_v30 = vpop.permute.xlu1 %3313 }
0x15d8   :  { %v3316_v32 = vunpack.i.h.bf16 %v3314_v30  ;;  %v3315_v15 = vunpack.i.l.bf16 %v3314_v30  ;;  %v3319_v34 = vpop.permute.xlu0 %3318 }
0x15d9   :  { %v3321_v63 = vunpack.i.h.bf16 %v3319_v34  ;;  %v3320_v39 = vunpack.i.l.bf16 %v3319_v34 }
0x15da   :  { %v2429_v1 = vsel %vm170_vm2, %v1743_v36, %v3315_v15  ;;  %v2430_v12 = vsel %vm170_vm2, %v1744_v38, %v3316_v32  ;;  %v3354_v15 = vld [vmem:[%s4215_s10 + $0x18] sm:$0xff]   ;;  %v2882_v36 = vld [vmem:[%s4218_s9 + $0x1] ss:$0 sm:$0xff] }
0x15db   :  { %v2432_v19 = vsel %vm1073_vm4, %v2430_v12, %v3321_v63  ;;  %v2431_v46 = vsel %vm1073_vm4, %v2429_v1, %v3320_v39  ;;  %v2684_v34 = vsel %vm1314_vm6, %v3354_v15, 0 }
0x15fd   :  { %v2347_v11 = vpop.f32.mrb[52].mxu0 }
0x15fe   :  { %v3245_v16 = vpop.f32.mrb[53].mxu0  ;;  %v2403_v23 = vmul.f32 %v3420_v57, %v2347_v11  ;;  %v2608_v11 = vsel %vm102_vm0, %v3352_v10, 0  ;;  %v2900_v10 = vld [vmem:[%s4221_s13 + $0x1] ss:$0 sm:$0xff] }
0x15ff   :  { %v2350_v17 = vpop.f32.mrb[54].mxu0  ;;  %3268 = vmatpush3.bf16.xpose.msra.mxu1 %v2608_v11  ;;  %v3353_v16 = vld [vmem:[%s4215_s10 + $0x10] sm:$0xff]  }
0x1600   :  { %v3246_v18 = vpop.f32.mrb[55].mxu0  ;;  %v2681_v17 = vsel %vm1314_vm6, %v3353_v16, 0 }
0x1605   :  { %v2395_v22 = vpop.f32.mrb[88].mxu1 }
0x1606   :  { %v2404_v25 = vmul.f32 %v3422_v20, %v2395_v22  ;;  %v3251_v13 = vpop.f32.mrb[89].mxu1 }
0x1607   :  { %v2398_v26 = vpop.f32.mrb[90].mxu1 }
0x1608   :  { %v3322_v27 = vpack.i.bf16 %v2404_v25, %v2403_v23  ;;  %v3252_v14 = vpop.f32.mrb[91].mxu1  ;;  %v2871_v26 = vld [vmem:[%s4216_s6 + $0x1] ss:$0 sm:$0xff] }
0x160a   :  { %3323 = vrot.lane.b32.xlu1 %v3322_v27, %s4228_s4 }
0x167c   :  { %v3324_v40 = vpop.permute.xlu1 %3323 }
0x167d   :  { %v3326_v42 = vunpack.i.h.bf16 %v3324_v40  ;;  %v3325_v43 = vunpack.i.l.bf16 %v3324_v40 }
0x167f   :  { %v2434_v47 = vsel %vm1076_vm5, %v2432_v19, %v3326_v42  ;;  %v2433_v48 = vsel %vm1076_vm5, %v2431_v46, %v3325_v43  ;;  %v2893_v46 = vld [vmem:[%s4219_s11 + $0x1] ss:$0 sm:$0xff] }
0x1680   :  { %v2442_v45 = vpack.c.bf16 %v2434_v47, %v2433_v48 }
0x1682   :  { %3258 = vmatmul.mubr.msk.bf16.vlgmr.msra.gmra.mrb[56].mxu0 %vm102_vm0, %v2442_v45 }
0x1683   :  { %3277 = vmatprep.mubr.msk.bf16.mxu0 %vm3438_vm1, %v3437_v0  ;;  %3274 = vmatpush3.bf16.xpose.msra.mxu0 %v2681_v17 }
0x1684   :  { %3275 = vmatprep.subr.bf16.mxu0 %v3437_v0  ;;  %v2872_v0 = vld [vmem:[%s4217_s7 + $0x1] ss:$0 sm:$0xff] }
0x168b   :  { %3276 = vmatpush3.bf16.xpose.msra.mxu0 %v2684_v34 }
0x1755   :  { %v2502_v51 = vpop.f32.mrb[56].mxu0 }
0x1756   :  { %v2503_v52 = vadd.f32 %v2865_v49, %v2502_v51  ;;  %v3259_v53 = vpop.f32.mrb[57].mxu0 }
0x1757   :  { %v2505_v55 = vpop.f32.mrb[58].mxu0 }
0x1758   :  { %v2506_v58 = vadd.f32 %v2865_v49, %v2505_v55  ;;  %v3260_v44 = vpop.f32.mrb[59].mxu0  ;;  %v2509_v59 = vadd.f32 %v2503_v52, %v3903_v56 }
0x175a   :  { %v2515_v28 = vsel %vm102_vm0, %v2509_v59, 0.0  ;;  %v2510_v60 = vadd.f32 %v2506_v58, %v3905_v37 }
0x175b   :  { %2516 = vadd.xlane.f32.xlu1 %v2515_v28 }
0x175c   :  { %v2518_v62 = vsel %vm102_vm0, %v2510_v60, 0.0 }
0x175d   :  { %2519 = vadd.xlane.f32.xlu0 %v2518_v62 }
0x17e8   :  { %v2517_v35 = vpop.xlane.xlu1 %2516 }
0x17e9   :  { %v2521_v2 = vmul.f32 0.03125, %v2517_v35 }
0x17ea   :  { %v2520_v56 = vpop.xlane.xlu0 %2519 }
0x17eb   :  { %v2523_v3 = vsub.f32 %v2509_v59, %v2521_v2  ;;  %v2522_v41 = vmul.f32 0.03125, %v2520_v56 }
0x17ed   :  { %v2524_v33 = vsub.f32 %v2510_v60, %v2522_v41  ;;  %v2525_v37 = vmul.f32 %v2523_v3, %v2523_v3 }
0x17ef   :  { %v2527_v5 = vsel %vm102_vm0, %v2525_v37, 0.0  ;;  %v2526_v6 = vmul.f32 %v2524_v33, %v2524_v33 }
0x17f0   :  { %2528 = vadd.xlane.f32.xlu0 %v2527_v5 }
0x17f1   :  { %v2530_v4 = vsel %vm102_vm0, %v2526_v6, 0.0 }
0x17f2   :  { %2531 = vadd.xlane.f32.xlu1 %v2530_v4 }
0x187d   :  { %v2529_v18 = vpop.xlane.xlu0 %2528 }
0x187e   :  { %v2533_v57 = vmul.f32 0.03125, %v2529_v18 }
0x187f   :  { %v2532_v20 = vpop.xlane.xlu1 %2531 }
0x1880   :  { %v2535_v22 = vadd.f32 1e-05, %v2533_v57  ;;  %v2534_v23 = vmul.f32 0.03125, %v2532_v20 }
0x1882   :  { %3427 = vrsqrt.f32 %v2535_v22  ;;  %v2536_v25 = vadd.f32 1e-05, %v2534_v23 }
0x1884   :  { %3429 = vrsqrt.f32 %v2536_v25 }
0x188c   :  { %v3428_v13 = vpop.eup %3427 }
0x188d   :  { %v2539_v27 = vmul.f32 %v3428_v13, %v2523_v3 }
0x188e   :  { %v3430_v14 = vpop.eup %3429 }
0x188f   :  { %v2547_v29 = vmul.f32 %v2871_v26, %v2539_v27  ;;  %v2540_v50 = vmul.f32 %v3430_v14, %v2524_v33 }
0x1891   :  { %v2548_v30 = vmul.f32 %v2871_v26, %v2540_v50  ;;  %v2555_v31 = vadd.f32 %v2872_v0, %v2547_v29 }
0x1893   :  { %v2556_v7 = vadd.f32 %v2872_v0, %v2548_v30 }
0x1895   :  { %v2568_v32 = vpack.c.bf16 %v2556_v7, %v2555_v31 }
0x1897   :  { %3270 = vmatmul.mubr.msk.bf16.vlgmr.msra.gmra.mrb[92].mxu1 %vm102_vm0, %v2568_v32 }
0x196a   :  { %v2644_v38 = vpop.f32.mrb[92].mxu1 }
0x196b   :  { %v2645_v63 = vadd.f32 %v2882_v36, %v2644_v38  ;;  %v3271_v39 = vpop.f32.mrb[93].mxu1 }
0x196c   :  { %v2647_v1 = vpop.f32.mrb[94].mxu1 }
0x196d   :  { %v2648_v12 = vadd.f32 %v2882_v36, %v2647_v1  ;;  %v3272_v40 = vpop.f32.mrb[95].mxu1  ;;  %v2651_v42 = vmax.f32 %v2645_v63, 0.0 }
0x196f   :  { %v2652_v43 = vmax.f32 %v2648_v12, 0.0 }
0x1971   :  { %v2660_v19 = vpack.c.bf16 %v2652_v43, %v2651_v42 }
0x1973   :  { %3278 = vmatmul.mubr.msk.bf16.vlgmr.msra.gmra.mrb[60].mxu0 %vm1314_vm6, %v2660_v19 }
0x1a46   :  { %v2720_v47 = vpop.f32.mrb[60].mxu0 }
0x1a47   :  { %v2721_v48 = vadd.f32 %v2893_v46, %v2720_v47  ;;  %v3279_v45 = vpop.f32.mrb[61].mxu0 }
0x1a48   :  { %v2723_v49 = vpop.f32.mrb[62].mxu0 }
0x1a49   :  { %v2727_v51 = vadd.f32 %v2721_v48, %v2555_v31  ;;  %v2724_v52 = vadd.f32 %v2893_v46, %v2723_v49  ;;  %v3280_v53 = vpop.f32.mrb[63].mxu0 }
0x1a4b   :  { %v2733_v55 = vsel %vm102_vm0, %v2727_v51, 0.0  ;;  %v2728_v58 = vadd.f32 %v2724_v52, %v2556_v7 }
0x1a4c   :  { %2734 = vadd.xlane.f32.xlu0 %v2733_v55 }
0x1a4d   :  { %v2736_v44 = vsel %vm102_vm0, %v2728_v58, 0.0 }
0x1a4e   :  { %2737 = vadd.xlane.f32.xlu1 %v2736_v44 }
0x1ad9   :  { %v2735_v59 = vpop.xlane.xlu0 %2734 }
0x1ada   :  { %v2739_v28 = vmul.f32 0.03125, %v2735_v59 }
0x1adb   :  { %v2738_v60 = vpop.xlane.xlu1 %2737 }
0x1adc   :  { %v2741_v62 = vsub.f32 %v2727_v51, %v2739_v28  ;;  %v2740_v24 = vmul.f32 0.03125, %v2738_v60 }
0x1ade   :  { %v2742_v21 = vsub.f32 %v2728_v58, %v2740_v24  ;;  %v2743_v35 = vmul.f32 %v2741_v62, %v2741_v62 }
0x1ae0   :  { %v2745_v2 = vsel %vm102_vm0, %v2743_v35, 0.0  ;;  %v2744_v56 = vmul.f32 %v2742_v21, %v2742_v21 }
0x1ae1   :  { %2746 = vadd.xlane.f32.xlu0 %v2745_v2 }
0x1ae2   :  { %v2748_v3 = vsel %vm102_vm0, %v2744_v56, 0.0 }
0x1ae3   :  { %2749 = vadd.xlane.f32.xlu1 %v2748_v3 }
0x1b6e   :  { %v2747_v41 = vpop.xlane.xlu0 %2746 }
0x1b6f   :  { %v2751_v33 = vmul.f32 0.03125, %v2747_v41 }
0x1b70   :  { %v2750_v37 = vpop.xlane.xlu1 %2749 }
0x1b71   :  { %v2753_v5 = vadd.f32 1e-05, %v2751_v33  ;;  %v2752_v6 = vmul.f32 0.03125, %v2750_v37 }
0x1b73   :  { %3431 = vrsqrt.f32 %v2753_v5  ;;  %v2754_v4 = vadd.f32 1e-05, %v2752_v6 }
0x1b75   :  { %3433 = vrsqrt.f32 %v2754_v4 }
0x1b7d   :  { %v3432_v9 = vpop.eup %3431 }
0x1b7e   :  { %v2757_v54 = vmul.f32 %v3432_v9, %v2741_v62 }
0x1b7f   :  { %v3434_v8 = vpop.eup %3433 }
0x1b80   :  { %v2765_v11 = vmul.f32 %v2899_v61, %v2757_v54  ;;  %v2758_v16 = vmul.f32 %v3434_v8, %v2742_v21 }
0x1b82   :  { %v2773_v17 = vadd.f32 %v2900_v10, %v2765_v11  ;;  %v2766_v18 = vmul.f32 %v2899_v61, %v2758_v16 }
0x1b84   :  { %2775 = vst.msk [vmem:[%s4222_s14] sm:$0xff] %vm102_vm0, %v2773_v17  ;;  %v2774_v57 = vadd.f32 %v2900_v10, %v2766_v18 }
0x1b86   :  { %2776 = vst.msk [vmem:[%s4222_s14 + $0x8] sm:$0xff] %vm102_vm0, %v2774_v57 }

</bundles_post_ra>
